<compile_context>
chip_gen: v7x
topology: tpu7x:2x2x1
jax: 0.10.0
libtpu: 0.0.40
codegen_flags: <defaults>
</compile_context>

<pallas_src>
import functools
import math

import jax
import jax.numpy as jnp
from jax import lax
from jax.experimental import pallas as pl
from jax.experimental.pallas import tpu as pltpu

_NEG_BIG = -1e30       # strong additive mask; exp() underflows to exactly 0.0
_REL_ZERO_FILL = -1e4  # matches the reference masked_fill(rel == 0, -1e4)


def _round_up(x, m):
    return ((x + m - 1) // m) * m


def _vmem_capacity_bytes():
    try:
        return int(pltpu.get_tpu_info().vmem_capacity_bytes)
    except Exception:
        return 128 * 1024 * 1024


def _vmem_limit_bytes():
    # ~96 MiB on 128 MiB parts (v5e/v6e), ~48 MiB on 64 MiB parts (v7x):
    # leave headroom for the double-buffered in/out blocks.
    cap = _vmem_capacity_bytes()
    return int(min(cap * 3 // 4, 100 * 1024 * 1024))


def _softmax_rows(x):
    """Exact row softmax in f32 (stored attention maps must sum to 1)."""
    m = jnp.max(x, axis=-1, keepdims=True)
    e = jnp.exp(x - m)
    return e / jnp.sum(e, axis=-1, keepdims=True)


# ----------------------------------------------------------------------------
# Fused lin_in(+ReLU) + Q/K/V projection kernel
# ----------------------------------------------------------------------------
def _input_qkv_kernel(x_ref, qry_ref, w_in_ref, b_in_ref, w_q_ref, b_q_ref,
                      w_kv_ref, b_kv_ref, o_ref):
    # x_ref: (TM, 2E) bf16, qry_ref: (TM, E) bf16; weights bf16, biases f32.
    h = jnp.dot(x_ref[...], w_in_ref[...],
                preferred_element_type=jnp.float32) + b_in_ref[...]
    h = jnp.maximum(h, 0.0)                                    # lin_in + ReLU (f32)
    q = jnp.dot(qry_ref[...], w_q_ref[...],
                preferred_element_type=jnp.float32) + b_q_ref[...]
    kv = jnp.dot(h.astype(jnp.bfloat16), w_kv_ref[...],
                 preferred_element_type=jnp.float32) + b_kv_ref[...]
    E = q.shape[1]
    # Two direct sub-stores (no (TM, 3E) concatenate temporary): [ Q | K | V ].
    o_ref[:, :E] = q.astype(o_ref.dtype)
    o_ref[:, E:] = kv.astype(o_ref.dtype)


def _pick_row_tile(rows):
    max_tm = 1024 if _vmem_capacity_bytes() >= (100 << 20) else 512
    if rows >= max_tm:
        return max_tm
    return max(8, _round_up(rows, 8))   # small case: one (padded) block


def pallas_input_qkv(x2e, query, w_in, b_in, w_q, b_q, w_kv, b_kv):
    """x2e: (R, 2E) bf16, query: (R, E) bf16 -> (R, 3E) bf16 laid out [Q | K | V]."""
    R, two_e = x2e.shape
    E = query.shape[1]
    TM = _pick_row_tile(R)
    Rp = _round_up(R, TM)
    if Rp != R:  # zero-pad instead of a single giant fallback block
        x2e = jnp.pad(x2e, ((0, Rp - R), (0, 0)))
        query = jnp.pad(query, ((0, Rp - R), (0, 0)))
    to_bf16 = lambda a: a.astype(jnp.bfloat16)
    row_bias = lambda b: b.reshape(1, -1).astype(jnp.float32)
    out = pl.pallas_call(
        _input_qkv_kernel,
        out_shape=jax.ShapeDtypeStruct((Rp, 3 * E), jnp.bfloat16),
        grid=(Rp // TM,),
        in_specs=[
            pl.BlockSpec((TM, two_e), lambda i: (i, 0)),     # x (lin_in input)
            pl.BlockSpec((TM, E), lambda i: (i, 0)),         # query
            pl.BlockSpec((two_e, E), lambda i: (0, 0)),      # W_in
            pl.BlockSpec((1, E), lambda i: (0, 0)),          # b_in
            pl.BlockSpec((E, E), lambda i: (0, 0)),          # W_q
            pl.BlockSpec((1, E), lambda i: (0, 0)),          # b_q
            pl.BlockSpec((E, 2 * E), lambda i: (0, 0)),      # [W_k | W_v]
            pl.BlockSpec((1, 2 * E), lambda i: (0, 0)),      # [b_k | b_v]
        ],
        out_specs=pl.BlockSpec((TM, 3 * E), lambda i: (i, 0)),
        compiler_params=pltpu.CompilerParams(
            dimension_semantics=("parallel",),
            vmem_limit_bytes=_vmem_limit_bytes()),
    )(x2e, query, to_bf16(w_in), row_bias(b_in), to_bf16(w_q), row_bias(b_q),
      to_bf16(w_kv), row_bias(b_kv))
    return out[:R] if Rp != R else out


# ----------------------------------------------------------------------------
# Relative multi-head attention kernel: grid = (B, H), h innermost ("arbitrary")
# ----------------------------------------------------------------------------
def _attention_kernel(lmix_ref, qkvh_ref, rel_ref, ts_ref, pk_ref, pv_ref,
                      o_ref, attn_ref,
                      timea_sc, rela_sc, neg_sc, bmask_sc,
                      *, head_dim, max_pos):
    d, P = head_dim, max_pos
    S = rel_ref.shape[1]
    h = pl.program_id(1)
    inv_sqrt_d = 1.0 / math.sqrt(d)

    # ---- head-invariant structures: built once per batch (h == 0), reused ------
    @pl.when(h == 0)
    def _():
        rel = rel_ref[0].astype(jnp.float32)
        ts = ts_ref[0].astype(jnp.float32)
        row = lax.broadcasted_iota(jnp.int32, (S, S), 0)
        col = lax.broadcasted_iota(jnp.int32, (S, S), 1)
        fmask = col > row                                  # causal (future) mask
        neg = jnp.where(fmask, _NEG_BIG, 0.0)              # additive form
        neg_sc[...] = neg
        ridx = jnp.clip(row - col, 0, P - 1)               # relative-distance bucket
        for p in range(P):
            bmask_sc[p] = jnp.where(ridx == p, 1.0, 0.0)
        # Time-decay attention (forgetting behaviour).
        timea_sc[...] = _softmax_rows(jnp.exp(-jnp.abs(ts)) + neg)
        # Relation attention: zero entries get the weak reference fill value; the
        # strong causal mask is re-applied so an all-zero relation row cannot leak
        # future positions through the l1 mixing term.
        rel_m = jnp.where(fmask, 0.0, rel)
        rela_sc[...] = _softmax_rows(
            jnp.where(rel_m == 0.0, _REL_ZERO_FILL, rel_m) + neg)

    # ---- per-head work ----------------------------------------------------------
    qkvh = qkvh_ref[0, 0]                    # (S, 3d) bf16: [ q_h | k_h | v_h ]
    qh = qkvh[:, :d]
    kh = qkvh[:, d:2 * d]
    vh = qkvh[:, 2 * d:]
    pk = pk_ref[...]                         # (P, d) bf16
    pv = pv_ref[...].astype(jnp.float32)     # (P, d) f32

    # Content scores on the MXU (bf16 in, f32 accumulate).
    scores = lax.dot_general(qh, kh, (((1,), (1,)), ((), ())),
                             preferred_element_type=jnp.float32)      # (S, S)
    # Shaw factorization: q @ pos_key_table^T, then scatter the (S, P) logits onto
    # (S, S) using the precomputed bucket masks (loads + FMAs, no compares/selects).
    pos_logits = lax.dot_general(qh, pk, (((1,), (1,)), ((), ())),
                                 preferred_element_type=jnp.float32)  # (S, P)
    pos_scores = jnp.zeros((S, S), jnp.float32)
    for p in range(P):
        pos_scores = pos_scores + bmask_sc[p] * pos_logits[:, p:p + 1]

    logits = (scores + pos_scores) * inv_sqrt_d + neg_sc[...]
    prob = _softmax_rows(logits)

    # l1 / l2 mixing folded into one FMA chain.
    l1 = lmix_ref[0]
    l2 = lmix_ref[1]
    c_self = (1.0 - l1) * (1.0 - l2)
    c_time = (1.0 - l1) * l2
    c_rel = l1
    prob = c_self * prob + c_time * timea_sc[...] + c_rel * rela_sc[...]
    attn_ref[0, 0] = prob.astype(attn_ref.dtype)

    out_h = lax.dot_general(prob.astype(jnp.bfloat16), vh,
                            (((1,), (0,)), ((), ())),
                            preferred_element_type=jnp.float32)       # (S, d)
    # Relative-position values: bucket probabilities by distance, mix table rows.
    for p in range(P):
        w_p = jnp.sum(bmask_sc[p] * prob, axis=-1, keepdims=True)     # (S, 1)
        out_h = out_h + w_p * pv[p:p + 1, :]

    o_ref[0, 0] = out_h.astype(o_ref.dtype)


def pallas_relative_attention(qkv_heads, rel, ts, pos_key, pos_value, lmix):
    """qkv_heads: (B,H,S,3d) bf16; rel,ts: (B,S,S) bf16; pos_*: (P,d) bf16; lmix: (2,)."""
    B, H, S, three_d = qkv_heads.shape
    d = three_d // 3
    P = pos_key.shape[0]
    kernel = functools.partial(_attention_kernel, head_dim=d, max_pos=P)
    out_shapes = (jax.ShapeDtypeStruct((B, H, S, d), jnp.float32),
                  jax.ShapeDtypeStruct((B, H, S, S), jnp.bfloat16))
    return pl.pallas_call(
        kernel,
        out_shape=out_shapes,
        grid=(B, H),
        in_specs=[
            pl.BlockSpec(memory_space=pltpu.MemorySpace.SMEM),            # lmix (2,)
            pl.BlockSpec((1, 1, S, three_d), lambda b, h: (b, h, 0, 0)),  # qkv (head h)
            pl.BlockSpec((1, S, S), lambda b, h: (b, 0, 0)),              # rel (resident over h)
            pl.BlockSpec((1, S, S), lambda b, h: (b, 0, 0)),              # timestamp
            pl.BlockSpec((P, d), lambda b, h: (0, 0)),                    # pos_key table
            pl.BlockSpec((P, d), lambda b, h: (0, 0)),                    # pos_value table
        ],
        out_specs=(
            pl.BlockSpec((1, 1, S, d), lambda b, h: (b, h, 0, 0)),        # per-head output
            pl.BlockSpec((1, 1, S, S), lambda b, h: (b, h, 0, 0)),        # per-head attn (bf16)
        ),
        scratch_shapes=[
            pltpu.VMEM((S, S), jnp.float32),      # time-decay attention (per batch)
            pltpu.VMEM((S, S), jnp.float32),      # relation attention   (per batch)
            pltpu.VMEM((S, S), jnp.float32),      # additive causal mask
            pltpu.VMEM((P, S, S), jnp.float32),   # relative-distance bucket masks
        ],
        compiler_params=pltpu.CompilerParams(
            dimension_semantics=("parallel", "arbitrary"),
            vmem_limit_bytes=_vmem_limit_bytes()),
    )(lmix.astype(jnp.float32), qkv_heads, rel, ts, pos_key, pos_value)


# ----------------------------------------------------------------------------
# NGFKT forward (glue in plain JAX, hot paths in Pallas)
# ----------------------------------------------------------------------------
@functools.partial(jax.jit, static_argnums=(1, 2))
def ngfkt_forward(params, skill_nums, num_heads, q_matrix, item_inputs,
                  label_inputs, item_ids, rel, timestamp):
    E = params["item_embeds"].shape[1]
    B, S = item_inputs.shape
    d = E // num_heads

    # ---- get_inputs / get_knowledge_embedding --------------------------------
    if skill_nums > 1000:
        item_emb = params["item_embeds"][item_inputs]          # embedding lookup
    else:
        item_emb = q_matrix[item_inputs]                       # q-matrix rows
        item_emb = item_emb.at[:, 0, :].set(0.0)               # j == 0 -> zeros
    label = label_inputs[..., None].astype(jnp.float32)
    x2e = jnp.concatenate([item_emb * label, item_emb * (1.0 - label)], axis=-1)

    # ---- query ----------------------------------------------------------------
    query = params["item_embeds"][item_ids]

    # ---- fused lin_in(+ReLU) + Q/K/V projection (one lane-dense matmul call) ---
    qkv = pallas_input_qkv(
        x2e.reshape(B * S, 2 * E).astype(jnp.bfloat16),
        query.reshape(B * S, E).astype(jnp.bfloat16),
        params["lin_in_w"], params["lin_in_b"],
        params["wq"], params["bq"],
        jnp.concatenate([params["wk"], params["wv"]], axis=1),
        jnp.concatenate([params["bk"], params["bv"]], axis=0),
    )

    # Head-major re-layout so the attention grid can index heads via BlockSpec
    # (lane-dim head slices of width d < 128 cannot be expressed as blocks).
    qkv_heads = (qkv.reshape(B, S, 3, num_heads, d)
                    .transpose(0, 3, 1, 2, 4)
                    .reshape(B, num_heads, S, 3 * d))

    # ---- relative multi-head attention (RKT-style), grid = (B, H) --------------
    lmix = jnp.stack([params["l1"], params["l2"]])
    head_out, attn = pallas_relative_attention(
        qkv_heads,
        rel.astype(jnp.bfloat16), timestamp.astype(jnp.bfloat16),
        params["pos_key_embeds"].astype(jnp.bfloat16),
        params["pos_value_embeds"].astype(jnp.bfloat16),
        lmix)
    out = head_out.transpose(0, 2, 1, 3).reshape(B, S, E)      # (B, S, E)
    # dropout -> identity (eval mode)

    # ---- lin_out: Dout = 1 is lane-thin, leave it to XLA ------------------------
    preds = out @ params["lin_out_w"] + params["lin_out_b"]
    return preds, attn


# ----------------------------------------------------------------------------
# Deterministic parameter / input construction + smoke test
# ----------------------------------------------------------------------------
def make_params(key, num_items, embed_size, num_heads, max_pos):
    d = embed_size // num_heads
    keys = jax.random.split(key, 16)
    u = lambda k, shape, s=0.1: (jax.random.uniform(k, shape, jnp.float32) - 0.5) * 2 * s
    item_embeds = u(keys[0], (num_items + 1, embed_size))
    item_embeds = item_embeds.at[0].set(0.0)                   # padding_idx = 0
    params = {
        "item_embeds": item_embeds,
        "pos_key_embeds": u(keys[1], (max_pos, d)),
        "pos_value_embeds": u(keys[2], (max_pos, d)),
        # TODO(synk): clip_factor / guessing_factor initialized but unused (see header).
        "clip_factor": u(keys[3], (embed_size, embed_size)),
        "guessing_factor": u(keys[4], (embed_size, embed_size)),
        "lin_in_w": u(keys[5], (2 * embed_size, embed_size)),
        "lin_in_b": u(keys[6], (embed_size,)),
        "wq": u(keys[7], (embed_size, embed_size)),
        "bq": u(keys[8], (embed_size,)),
        "wk": u(keys[9], (embed_size, embed_size)),
        "bk": u(keys[10], (embed_size,)),
        "wv": u(keys[11], (embed_size, embed_size)),
        "bv": u(keys[12], (embed_size,)),
        "lin_out_w": u(keys[13], (embed_size, 1)),
        "lin_out_b": u(keys[14], (1,)),
        "l1": jax.random.uniform(keys[15], (), jnp.float32),
        "l2": jax.random.uniform(jax.random.fold_in(keys[15], 1), (), jnp.float32),
    }
    return params


if __name__ == "__main__":
    num_items = 20
    embed_size = 32
    num_heads = 4
    num_attn_layers = 1
    max_pos = 10
    B, S = 2, 8              # B even -> both v7x TensorCores get work
    skill_nums = 20          # <= 1000 -> knowledge-embedding (q-matrix) path

    root = jax.random.PRNGKey(0)
    k_par, k_qm, k_ii, k_lb, k_id, k_rel, k_ts = jax.random.split(root, 7)

    params = make_params(k_par, num_items, embed_size, num_heads, max_pos)

    q_matrix = jax.random.uniform(k_qm, (num_items + 1, embed_size), jnp.float32)
    item_inputs = jax.random.randint(k_ii, (B, S), 0, num_items + 1, jnp.int32)
    label_inputs = jax.random.bernoulli(k_lb, 0.5, (B, S)).astype(jnp.float32)
    item_ids = jax.random.randint(k_id, (B, S), 1, num_items + 1, jnp.int32)
    rel = jax.random.uniform(k_rel, (B, S, S), jnp.float32)
    timestamp = jax.random.uniform(k_ts, (B, S, S), jnp.float32) * 10.0

    preds, attn = ngfkt_forward(params, skill_nums, num_heads, q_matrix,
                                item_inputs, label_inputs, item_ids, rel, timestamp)
    jax.block_until_ready((preds, attn))

    assert preds.shape == (B, S, 1)
    assert attn.shape == (B, num_heads, S, S)
    assert bool(jnp.all(jnp.isfinite(preds))) and bool(jnp.all(jnp.isfinite(attn)))
    print("KERNEL_OK")
</pallas_src>

<mosaic_0001>
module attributes {stable_mosaic.version = 11 : i64} {
  func.func @_input_qkv_kernel(%arg0: i32, %arg1: memref<16x64xbf16, #tpu.memory_space<vmem>>, %arg2: memref<16x32xbf16, #tpu.memory_space<vmem>>, %arg3: memref<64x32xbf16, #tpu.memory_space<vmem>>, %arg4: memref<1x32xf32, #tpu.memory_space<vmem>>, %arg5: memref<32x32xbf16, #tpu.memory_space<vmem>>, %arg6: memref<1x32xf32, #tpu.memory_space<vmem>>, %arg7: memref<32x64xbf16, #tpu.memory_space<vmem>>, %arg8: memref<1x64xf32, #tpu.memory_space<vmem>>, %arg9: memref<16x96xbf16, #tpu.memory_space<vmem>>) attributes {dimension_semantics = [#tpu.dimension_semantics<parallel>], iteration_bounds = array<i64: 1>, scalar_prefetch = 0 : i64, scratch_operands = 0 : i64, tpu.core_type = #tpu.core_type<tc>, window_params = [{transform_indices = @transform_0, window_bounds = array<i64: 16, 64>}, {transform_indices = @transform_1, window_bounds = array<i64: 16, 32>}, {pipeline_mode = #tpu.pipeline_mode<synchronous>, transform_indices = @transform_2, window_bounds = array<i64: 64, 32>}, {pipeline_mode = #tpu.pipeline_mode<synchronous>, transform_indices = @transform_3, window_bounds = array<i64: 1, 32>}, {pipeline_mode = #tpu.pipeline_mode<synchronous>, transform_indices = @transform_4, window_bounds = array<i64: 32, 32>}, {pipeline_mode = #tpu.pipeline_mode<synchronous>, transform_indices = @transform_5, window_bounds = array<i64: 1, 32>}, {pipeline_mode = #tpu.pipeline_mode<synchronous>, transform_indices = @transform_6, window_bounds = array<i64: 32, 64>}, {pipeline_mode = #tpu.pipeline_mode<synchronous>, transform_indices = @transform_7, window_bounds = array<i64: 1, 64>}, {transform_indices = @transform_8, window_bounds = array<i64: 16, 96>}]} {
    %c0 = arith.constant 0 : index
    %c0_0 = arith.constant 0 : index
    %0 = vector.load %arg1[%c0, %c0_0] : memref<16x64xbf16, #tpu.memory_space<vmem>>, vector<16x64xbf16>
    %c0_1 = arith.constant 0 : index
    %c0_2 = arith.constant 0 : index
    %1 = vector.load %arg3[%c0_1, %c0_2] : memref<64x32xbf16, #tpu.memory_space<vmem>>, vector<64x32xbf16>
    %cst = arith.constant dense<0.000000e+00> : vector<16x32xf32>
    %2 = tpu.matmul %0, %1, %cst {dimension_numbers = #tpu.dot_dimension_numbers<[1], [0], [0], [1], [0, 0, 1, 1], [], []>} : vector<16x64xbf16>, vector<64x32xbf16>, vector<16x32xf32> -> vector<16x32xf32>
    %c0_3 = arith.constant 0 : index
    %c0_4 = arith.constant 0 : index
    %3 = vector.load %arg4[%c0_3, %c0_4] : memref<1x32xf32, #tpu.memory_space<vmem>>, vector<1x32xf32>
    %4 = vector.broadcast %3 : vector<1x32xf32> to vector<16x32xf32>
    %5 = arith.addf %2, %4 : vector<16x32xf32>
    %cst_5 = arith.constant 0.000000e+00 : f32
    %6 = vector.broadcast %cst_5 : f32 to vector<16x32xf32>
    %7 = arith.maximumf %5, %6 : vector<16x32xf32>
    %c0_6 = arith.constant 0 : index
    %c0_7 = arith.constant 0 : index
    %8 = vector.load %arg2[%c0_6, %c0_7] : memref<16x32xbf16, #tpu.memory_space<vmem>>, vector<16x32xbf16>
    %c0_8 = arith.constant 0 : index
    %c0_9 = arith.constant 0 : index
    %9 = vector.load %arg5[%c0_8, %c0_9] : memref<32x32xbf16, #tpu.memory_space<vmem>>, vector<32x32xbf16>
    %cst_10 = arith.constant dense<0.000000e+00> : vector<16x32xf32>
    %10 = tpu.matmul %8, %9, %cst_10 {dimension_numbers = #tpu.dot_dimension_numbers<[1], [0], [0], [1], [0, 0, 1, 1], [], []>} : vector<16x32xbf16>, vector<32x32xbf16>, vector<16x32xf32> -> vector<16x32xf32>
    %c0_11 = arith.constant 0 : index
    %c0_12 = arith.constant 0 : index
    %11 = vector.load %arg6[%c0_11, %c0_12] : memref<1x32xf32, #tpu.memory_space<vmem>>, vector<1x32xf32>
    %12 = vector.broadcast %11 : vector<1x32xf32> to vector<16x32xf32>
    %13 = arith.addf %10, %12 : vector<16x32xf32>
    %14 = arith.truncf %7 : vector<16x32xf32> to vector<16x32xbf16>
    %c0_13 = arith.constant 0 : index
    %c0_14 = arith.constant 0 : index
    %15 = vector.load %arg7[%c0_13, %c0_14] : memref<32x64xbf16, #tpu.memory_space<vmem>>, vector<32x64xbf16>
    %cst_15 = arith.constant dense<0.000000e+00> : vector<16x64xf32>
    %16 = tpu.matmul %14, %15, %cst_15 {dimension_numbers = #tpu.dot_dimension_numbers<[1], [0], [0], [1], [0, 0, 1, 1], [], []>} : vector<16x32xbf16>, vector<32x64xbf16>, vector<16x64xf32> -> vector<16x64xf32>
    %c0_16 = arith.constant 0 : index
    %c0_17 = arith.constant 0 : index
    %17 = vector.load %arg8[%c0_16, %c0_17] : memref<1x64xf32, #tpu.memory_space<vmem>>, vector<1x64xf32>
    %18 = vector.broadcast %17 : vector<1x64xf32> to vector<16x64xf32>
    %19 = arith.addf %16, %18 : vector<16x64xf32>
    %20 = arith.truncf %13 : vector<16x32xf32> to vector<16x32xbf16>
    %c0_18 = arith.constant 0 : index
    %c0_19 = arith.constant 0 : index
    %21 = vector.load %arg9[%c0_18, %c0_19] : memref<16x96xbf16, #tpu.memory_space<vmem>>, vector<16x32xbf16>
    tpu.vector_store %arg9[%c0_18, %c0_19], %20 {strides = array<i32>} : memref<16x96xbf16, #tpu.memory_space<vmem>>, vector<16x32xbf16>,
    %22 = arith.truncf %19 : vector<16x64xf32> to vector<16x64xbf16>
    %c0_20 = arith.constant 0 : index
    %c32 = arith.constant 32 : index
    %23 = vector.load %arg9[%c0_20, %c32] : memref<16x96xbf16, #tpu.memory_space<vmem>>, vector<16x64xbf16>
    tpu.vector_store %arg9[%c0_20, %c32], %22 {strides = array<i32>} : memref<16x96xbf16, #tpu.memory_space<vmem>>, vector<16x64xbf16>,
    return
  }
  func.func @transform_0(%arg0: i32) -> (i32, i32) {
    %c0_i32 = arith.constant 0 : i32
    %c0_i32_0 = arith.constant 0 : i32
    return %arg0, %c0_i32 : i32, i32
  }
  func.func @transform_1(%arg0: i32) -> (i32, i32) {
    %c0_i32 = arith.constant 0 : i32
    %c0_i32_0 = arith.constant 0 : i32
    return %arg0, %c0_i32 : i32, i32
  }
  func.func @transform_2(%arg0: i32) -> (i32, i32) {
    %c0_i32 = arith.constant 0 : i32
    %c0_i32_0 = arith.constant 0 : i32
    %c0_i32_1 = arith.constant 0 : i32
    return %c0_i32, %c0_i32_0 : i32, i32
  }
  func.func @transform_3(%arg0: i32) -> (i32, i32) {
    %c0_i32 = arith.constant 0 : i32
    %c0_i32_0 = arith.constant 0 : i32
    %c0_i32_1 = arith.constant 0 : i32
    return %c0_i32, %c0_i32_0 : i32, i32
  }
  func.func @transform_4(%arg0: i32) -> (i32, i32) {
    %c0_i32 = arith.constant 0 : i32
    %c0_i32_0 = arith.constant 0 : i32
    %c0_i32_1 = arith.constant 0 : i32
    return %c0_i32, %c0_i32_0 : i32, i32
  }
  func.func @transform_5(%arg0: i32) -> (i32, i32) {
    %c0_i32 = arith.constant 0 : i32
    %c0_i32_0 = arith.constant 0 : i32
    %c0_i32_1 = arith.constant 0 : i32
    return %c0_i32, %c0_i32_0 : i32, i32
  }
  func.func @transform_6(%arg0: i32) -> (i32, i32) {
    %c0_i32 = arith.constant 0 : i32
    %c0_i32_0 = arith.constant 0 : i32
    %c0_i32_1 = arith.constant 0 : i32
    return %c0_i32, %c0_i32_0 : i32, i32
  }
  func.func @transform_7(%arg0: i32) -> (i32, i32) {
    %c0_i32 = arith.constant 0 : i32
    %c0_i32_0 = arith.constant 0 : i32
    %c0_i32_1 = arith.constant 0 : i32
    return %c0_i32, %c0_i32_0 : i32, i32
  }
  func.func @transform_8(%arg0: i32) -> (i32, i32) {
    %c0_i32 = arith.constant 0 : i32
    %c0_i32_0 = arith.constant 0 : i32
    return %arg0, %c0_i32 : i32, i32
  }
}

module attributes {stable_mosaic.version = 11 : i64} {
  func.func @_attention_kernel(%arg0: i32, %arg1: i32, %arg2: memref<2xf32, #tpu.memory_space<smem>>, %arg3: memref<1x1x8x24xbf16, #tpu.memory_space<vmem>>, %arg4: memref<1x8x8xbf16, #tpu.memory_space<vmem>>, %arg5: memref<1x8x8xbf16, #tpu.memory_space<vmem>>, %arg6: memref<10x8xbf16, #tpu.memory_space<vmem>>, %arg7: memref<10x8xbf16, #tpu.memory_space<vmem>>, %arg8: memref<1x1x8x8xf32, #tpu.memory_space<vmem>>, %arg9: memref<1x1x8x8xbf16, #tpu.memory_space<vmem>>, %arg10: memref<8x8xf32, #tpu.memory_space<vmem>>, %arg11: memref<8x8xf32, #tpu.memory_space<vmem>>, %arg12: memref<8x8xf32, #tpu.memory_space<vmem>>, %arg13: memref<10x8x8xf32, #tpu.memory_space<vmem>>) attributes {dimension_semantics = [#tpu.dimension_semantics<parallel>, #tpu.dimension_semantics<arbitrary>], iteration_bounds = array<i64: 2, 4>, scalar_prefetch = 0 : i64, scratch_operands = 4 : i64, tpu.core_type = #tpu.core_type<tc>, window_params = [{transform_indices = @transform_0, window_bounds = array<i64: 2>}, {transform_indices = @transform_1, window_bounds = array<i64: 1, 1, 8, 24>}, {transform_indices = @transform_2, window_bounds = array<i64: 1, 8, 8>}, {transform_indices = @transform_3, window_bounds = array<i64: 1, 8, 8>}, {pipeline_mode = #tpu.pipeline_mode<synchronous>, transform_indices = @transform_4, window_bounds = array<i64: 10, 8>}, {pipeline_mode = #tpu.pipeline_mode<synchronous>, transform_indices = @transform_5, window_bounds = array<i64: 10, 8>}, {transform_indices = @transform_6, window_bounds = array<i64: 1, 1, 8, 8>}, {transform_indices = @transform_7, window_bounds = array<i64: 1, 1, 8, 8>}]} {
    %c0_i32 = arith.constant 0 : i32
    %0 = arith.cmpi eq, %arg1, %c0_i32 : i32
    %1 = arith.extui %0 : i1 to i32
    %c0_i32_0 = arith.constant 0 : i32
    %2 = arith.cmpi ne, %1, %c0_i32_0 : i32
    scf.if %2 {
      %c0_94 = arith.constant 0 : index
      %c0_95 = arith.constant 0 : index
      %c0_96 = arith.constant 0 : index
      %214 = vector.load %arg4[%c0_94, %c0_95, %c0_96] : memref<1x8x8xbf16, #tpu.memory_space<vmem>>, vector<1x8x8xbf16>
      %215 = vector.shape_cast %214 : vector<1x8x8xbf16> to vector<8x8xbf16>
      %216 = arith.extf %215 : vector<8x8xbf16> to vector<8x8xf32>
      %c0_97 = arith.constant 0 : index
      %c0_98 = arith.constant 0 : index
      %c0_99 = arith.constant 0 : index
      %217 = vector.load %arg5[%c0_97, %c0_98, %c0_99] : memref<1x8x8xbf16, #tpu.memory_space<vmem>>, vector<1x8x8xbf16>
      %218 = vector.shape_cast %217 : vector<1x8x8xbf16> to vector<8x8xbf16>
      %219 = arith.extf %218 : vector<8x8xbf16> to vector<8x8xf32>
      %220 = tpu.iota {dimensions = array<i32: 0>} : vector<8x8xi32>
      %221 = tpu.iota {dimensions = array<i32: 1>} : vector<8x8xi32>
      %222 = arith.cmpi sgt, %221, %220 : vector<8x8xi32>
      %cst_100 = arith.constant -1.000000e+30 : f32
      %cst_101 = arith.constant 0.000000e+00 : f32
      %223 = vector.broadcast %cst_100 : f32 to vector<8x8xf32>
      %224 = vector.broadcast %cst_101 : f32 to vector<8x8xf32>
      %225 = arith.select %222, %223, %224 : vector<8x8xi1>, vector<8x8xf32>
      %c0_102 = arith.constant 0 : index
      %c0_103 = arith.constant 0 : index
      %226 = vector.load %arg12[%c0_102, %c0_103] : memref<8x8xf32, #tpu.memory_space<vmem>>, vector<8x8xf32>
      tpu.vector_store %arg12[%c0_102, %c0_103], %225 {strides = array<i32>} : memref<8x8xf32, #tpu.memory_space<vmem>>, vector<8x8xf32>,
      %227 = arith.subi %220, %221 : vector<8x8xi32>
      %c0_i32_104 = arith.constant 0 : i32
      %c9_i32 = arith.constant 9 : i32
      %228 = vector.broadcast %c0_i32_104 : i32 to vector<8x8xi32>
      %229 = arith.maxsi %228, %227 : vector<8x8xi32>
      %230 = vector.broadcast %c9_i32 : i32 to vector<8x8xi32>
      %231 = arith.minsi %230, %229 : vector<8x8xi32>
      %c0_i32_105 = arith.constant 0 : i32
      %232 = vector.broadcast %c0_i32_105 : i32 to vector<8x8xi32>
      %233 = arith.cmpi eq, %231, %232 : vector<8x8xi32>
      %cst_106 = arith.constant 1.000000e+00 : f32
      %cst_107 = arith.constant 0.000000e+00 : f32
      %234 = vector.broadcast %cst_106 : f32 to vector<8x8xf32>
      %235 = vector.broadcast %cst_107 : f32 to vector<8x8xf32>
      %236 = arith.select %233, %234, %235 : vector<8x8xi1>, vector<8x8xf32>
      %c0_108 = arith.constant 0 : index
      %c0_109 = arith.constant 0 : index
      %c0_110 = arith.constant 0 : index
      %237 = vector.load %arg13[%c0_108, %c0_109, %c0_110] : memref<10x8x8xf32, #tpu.memory_space<vmem>>, vector<1x8x8xf32>
      %238 = vector.shape_cast %237 : vector<1x8x8xf32> to vector<8x8xf32>
      %239 = vector.shape_cast %236 : vector<8x8xf32> to vector<1x8x8xf32>
      tpu.vector_store %arg13[%c0_108, %c0_109, %c0_110], %239 {strides = array<i32>} : memref<10x8x8xf32, #tpu.memory_space<vmem>>, vector<1x8x8xf32>,
      %c1_i32 = arith.constant 1 : i32
      %240 = vector.broadcast %c1_i32 : i32 to vector<8x8xi32>
      %241 = arith.cmpi eq, %231, %240 : vector<8x8xi32>
      %cst_111 = arith.constant 1.000000e+00 : f32
      %cst_112 = arith.constant 0.000000e+00 : f32
      %242 = vector.broadcast %cst_111 : f32 to vector<8x8xf32>
      %243 = vector.broadcast %cst_112 : f32 to vector<8x8xf32>
      %244 = arith.select %241, %242, %243 : vector<8x8xi1>, vector<8x8xf32>
      %c1_113 = arith.constant 1 : index
      %c0_114 = arith.constant 0 : index
      %c0_115 = arith.constant 0 : index
      %245 = vector.load %arg13[%c1_113, %c0_114, %c0_115] : memref<10x8x8xf32, #tpu.memory_space<vmem>>, vector<1x8x8xf32>
      %246 = vector.shape_cast %245 : vector<1x8x8xf32> to vector<8x8xf32>
      %247 = vector.shape_cast %244 : vector<8x8xf32> to vector<1x8x8xf32>
      tpu.vector_store %arg13[%c1_113, %c0_114, %c0_115], %247 {strides = array<i32>} : memref<10x8x8xf32, #tpu.memory_space<vmem>>, vector<1x8x8xf32>,
      %c2_i32 = arith.constant 2 : i32
      %248 = vector.broadcast %c2_i32 : i32 to vector<8x8xi32>
      %249 = arith.cmpi eq, %231, %248 : vector<8x8xi32>
      %cst_116 = arith.constant 1.000000e+00 : f32
      %cst_117 = arith.constant 0.000000e+00 : f32
      %250 = vector.broadcast %cst_116 : f32 to vector<8x8xf32>
      %251 = vector.broadcast %cst_117 : f32 to vector<8x8xf32>
      %252 = arith.select %249, %250, %251 : vector<8x8xi1>, vector<8x8xf32>
      %c2_118 = arith.constant 2 : index
      %c0_119 = arith.constant 0 : index
      %c0_120 = arith.constant 0 : index
      %253 = vector.load %arg13[%c2_118, %c0_119, %c0_120] : memref<10x8x8xf32, #tpu.memory_space<vmem>>, vector<1x8x8xf32>
      %254 = vector.shape_cast %253 : vector<1x8x8xf32> to vector<8x8xf32>
      %255 = vector.shape_cast %252 : vector<8x8xf32> to vector<1x8x8xf32>
      tpu.vector_store %arg13[%c2_118, %c0_119, %c0_120], %255 {strides = array<i32>} : memref<10x8x8xf32, #tpu.memory_space<vmem>>, vector<1x8x8xf32>,
      %c3_i32 = arith.constant 3 : i32
      %256 = vector.broadcast %c3_i32 : i32 to vector<8x8xi32>
      %257 = arith.cmpi eq, %231, %256 : vector<8x8xi32>
      %cst_121 = arith.constant 1.000000e+00 : f32
      %cst_122 = arith.constant 0.000000e+00 : f32
      %258 = vector.broadcast %cst_121 : f32 to vector<8x8xf32>
      %259 = vector.broadcast %cst_122 : f32 to vector<8x8xf32>
      %260 = arith.select %257, %258, %259 : vector<8x8xi1>, vector<8x8xf32>
      %c3_123 = arith.constant 3 : index
      %c0_124 = arith.constant 0 : index
      %c0_125 = arith.constant 0 : index
      %261 = vector.load %arg13[%c3_123, %c0_124, %c0_125] : memref<10x8x8xf32, #tpu.memory_space<vmem>>, vector<1x8x8xf32>
      %262 = vector.shape_cast %261 : vector<1x8x8xf32> to vector<8x8xf32>
      %263 = vector.shape_cast %260 : vector<8x8xf32> to vector<1x8x8xf32>
      tpu.vector_store %arg13[%c3_123, %c0_124, %c0_125], %263 {strides = array<i32>} : memref<10x8x8xf32, #tpu.memory_space<vmem>>, vector<1x8x8xf32>,
      %c4_i32 = arith.constant 4 : i32
      %264 = vector.broadcast %c4_i32 : i32 to vector<8x8xi32>
      %265 = arith.cmpi eq, %231, %264 : vector<8x8xi32>
      %cst_126 = arith.constant 1.000000e+00 : f32
      %cst_127 = arith.constant 0.000000e+00 : f32
      %266 = vector.broadcast %cst_126 : f32 to vector<8x8xf32>
      %267 = vector.broadcast %cst_127 : f32 to vector<8x8xf32>
      %268 = arith.select %265, %266, %267 : vector<8x8xi1>, vector<8x8xf32>
      %c4_128 = arith.constant 4 : index
      %c0_129 = arith.constant 0 : index
      %c0_130 = arith.constant 0 : index
      %269 = vector.load %arg13[%c4_128, %c0_129, %c0_130] : memref<10x8x8xf32, #tpu.memory_space<vmem>>, vector<1x8x8xf32>
      %270 = vector.shape_cast %269 : vector<1x8x8xf32> to vector<8x8xf32>
      %271 = vector.shape_cast %268 : vector<8x8xf32> to vector<1x8x8xf32>
      tpu.vector_store %arg13[%c4_128, %c0_129, %c0_130], %271 {strides = array<i32>} : memref<10x8x8xf32, #tpu.memory_space<vmem>>, vector<1x8x8xf32>,
      %c5_i32 = arith.constant 5 : i32
      %272 = vector.broadcast %c5_i32 : i32 to vector<8x8xi32>
      %273 = arith.cmpi eq, %231, %272 : vector<8x8xi32>
      %cst_131 = arith.constant 1.000000e+00 : f32
      %cst_132 = arith.constant 0.000000e+00 : f32
      %274 = vector.broadcast %cst_131 : f32 to vector<8x8xf32>
      %275 = vector.broadcast %cst_132 : f32 to vector<8x8xf32>
      %276 = arith.select %273, %274, %275 : vector<8x8xi1>, vector<8x8xf32>
      %c5_133 = arith.constant 5 : index
      %c0_134 = arith.constant 0 : index
      %c0_135 = arith.constant 0 : index
      %277 = vector.load %arg13[%c5_133, %c0_134, %c0_135] : memref<10x8x8xf32, #tpu.memory_space<vmem>>, vector<1x8x8xf32>
      %278 = vector.shape_cast %277 : vector<1x8x8xf32> to vector<8x8xf32>
      %279 = vector.shape_cast %276 : vector<8x8xf32> to vector<1x8x8xf32>
      tpu.vector_store %arg13[%c5_133, %c0_134, %c0_135], %279 {strides = array<i32>} : memref<10x8x8xf32, #tpu.memory_space<vmem>>, vector<1x8x8xf32>,
      %c6_i32 = arith.constant 6 : i32
      %280 = vector.broadcast %c6_i32 : i32 to vector<8x8xi32>
      %281 = arith.cmpi eq, %231, %280 : vector<8x8xi32>
      %cst_136 = arith.constant 1.000000e+00 : f32
      %cst_137 = arith.constant 0.000000e+00 : f32
      %282 = vector.broadcast %cst_136 : f32 to vector<8x8xf32>
      %283 = vector.broadcast %cst_137 : f32 to vector<8x8xf32>
      %284 = arith.select %281, %282, %283 : vector<8x8xi1>, vector<8x8xf32>
      %c6_138 = arith.constant 6 : index
      %c0_139 = arith.constant 0 : index
      %c0_140 = arith.constant 0 : index
      %285 = vector.load %arg13[%c6_138, %c0_139, %c0_140] : memref<10x8x8xf32, #tpu.memory_space<vmem>>, vector<1x8x8xf32>
      %286 = vector.shape_cast %285 : vector<1x8x8xf32> to vector<8x8xf32>
      %287 = vector.shape_cast %284 : vector<8x8xf32> to vector<1x8x8xf32>
      tpu.vector_store %arg13[%c6_138, %c0_139, %c0_140], %287 {strides = array<i32>} : memref<10x8x8xf32, #tpu.memory_space<vmem>>, vector<1x8x8xf32>,
      %c7_i32 = arith.constant 7 : i32
      %288 = vector.broadcast %c7_i32 : i32 to vector<8x8xi32>
      %289 = arith.cmpi eq, %231, %288 : vector<8x8xi32>
      %cst_141 = arith.constant 1.000000e+00 : f32
      %cst_142 = arith.constant 0.000000e+00 : f32
      %290 = vector.broadcast %cst_141 : f32 to vector<8x8xf32>
      %291 = vector.broadcast %cst_142 : f32 to vector<8x8xf32>
      %292 = arith.select %289, %290, %291 : vector<8x8xi1>, vector<8x8xf32>
      %c7_143 = arith.constant 7 : index
      %c0_144 = arith.constant 0 : index
      %c0_145 = arith.constant 0 : index
      %293 = vector.load %arg13[%c7_143, %c0_144, %c0_145] : memref<10x8x8xf32, #tpu.memory_space<vmem>>, vector<1x8x8xf32>
      %294 = vector.shape_cast %293 : vector<1x8x8xf32> to vector<8x8xf32>
      %295 = vector.shape_cast %292 : vector<8x8xf32> to vector<1x8x8xf32>
      tpu.vector_store %arg13[%c7_143, %c0_144, %c0_145], %295 {strides = array<i32>} : memref<10x8x8xf32, #tpu.memory_space<vmem>>, vector<1x8x8xf32>,
      %c8_i32 = arith.constant 8 : i32
      %296 = vector.broadcast %c8_i32 : i32 to vector<8x8xi32>
      %297 = arith.cmpi eq, %231, %296 : vector<8x8xi32>
      %cst_146 = arith.constant 1.000000e+00 : f32
      %cst_147 = arith.constant 0.000000e+00 : f32
      %298 = vector.broadcast %cst_146 : f32 to vector<8x8xf32>
      %299 = vector.broadcast %cst_147 : f32 to vector<8x8xf32>
      %300 = arith.select %297, %298, %299 : vector<8x8xi1>, vector<8x8xf32>
      %c8_148 = arith.constant 8 : index
      %c0_149 = arith.constant 0 : index
      %c0_150 = arith.constant 0 : index
      %301 = vector.load %arg13[%c8_148, %c0_149, %c0_150] : memref<10x8x8xf32, #tpu.memory_space<vmem>>, vector<1x8x8xf32>
      %302 = vector.shape_cast %301 : vector<1x8x8xf32> to vector<8x8xf32>
      %303 = vector.shape_cast %300 : vector<8x8xf32> to vector<1x8x8xf32>
      tpu.vector_store %arg13[%c8_148, %c0_149, %c0_150], %303 {strides = array<i32>} : memref<10x8x8xf32, #tpu.memory_space<vmem>>, vector<1x8x8xf32>,
      %c9_i32_151 = arith.constant 9 : i32
      %304 = vector.broadcast %c9_i32_151 : i32 to vector<8x8xi32>
      %305 = arith.cmpi eq, %231, %304 : vector<8x8xi32>
      %cst_152 = arith.constant 1.000000e+00 : f32
      %cst_153 = arith.constant 0.000000e+00 : f32
      %306 = vector.broadcast %cst_152 : f32 to vector<8x8xf32>
      %307 = vector.broadcast %cst_153 : f32 to vector<8x8xf32>
      %308 = arith.select %305, %306, %307 : vector<8x8xi1>, vector<8x8xf32>
      %c9_154 = arith.constant 9 : index
      %c0_155 = arith.constant 0 : index
      %c0_156 = arith.constant 0 : index
      %309 = vector.load %arg13[%c9_154, %c0_155, %c0_156] : memref<10x8x8xf32, #tpu.memory_space<vmem>>, vector<1x8x8xf32>
      %310 = vector.shape_cast %309 : vector<1x8x8xf32> to vector<8x8xf32>
      %311 = vector.shape_cast %308 : vector<8x8xf32> to vector<1x8x8xf32>
      tpu.vector_store %arg13[%c9_154, %c0_155, %c0_156], %311 {strides = array<i32>} : memref<10x8x8xf32, #tpu.memory_space<vmem>>, vector<1x8x8xf32>,
      %312 = math.absf %219 : vector<8x8xf32>
      %cst_157 = arith.constant 0.000000e+00 : f32
      %313 = vector.broadcast %cst_157 : f32 to vector<8x8xf32>
      %314 = arith.subf %313, %312 : vector<8x8xf32>
      %315 = math.exp %314 : vector<8x8xf32>
      %316 = arith.addf %315, %225 : vector<8x8xf32>
      %cst_158 = arith.constant dense<0xFF800000> : vector<8xf32>
      %317 = vector.multi_reduction <maximumf>, %316, %cst_158 [1] : vector<8x8xf32> to vector<8xf32>
      %318 = vector.shape_cast %317 : vector<8xf32> to vector<8x1xf32>
      %319 = vector.broadcast %318 : vector<8x1xf32> to vector<8x8xf32>
      %320 = arith.subf %316, %319 : vector<8x8xf32>
      %321 = math.exp %320 : vector<8x8xf32>
      %cst_159 = arith.constant dense<0.000000e+00> : vector<8xf32>
      %322 = vector.multi_reduction <add>, %321, %cst_159 [1] : vector<8x8xf32> to vector<8xf32>
      %323 = vector.shape_cast %322 : vector<8xf32> to vector<8x1xf32>
      %324 = vector.broadcast %323 : vector<8x1xf32> to vector<8x8xf32>
      %325 = arith.divf %321, %324 : vector<8x8xf32>
      %c0_160 = arith.constant 0 : index
      %c0_161 = arith.constant 0 : index
      %326 = vector.load %arg10[%c0_160, %c0_161] : memref<8x8xf32, #tpu.memory_space<vmem>>, vector<8x8xf32>
      tpu.vector_store %arg10[%c0_160, %c0_161], %325 {strides = array<i32>} : memref<8x8xf32, #tpu.memory_space<vmem>>, vector<8x8xf32>,
      %cst_162 = arith.constant 0.000000e+00 : f32
      %327 = vector.broadcast %cst_162 : f32 to vector<8x8xf32>
      %328 = arith.select %222, %327, %216 : vector<8x8xi1>, vector<8x8xf32>
      %cst_163 = arith.constant 0.000000e+00 : f32
      %329 = vector.broadcast %cst_163 : f32 to vector<8x8xf32>
      %330 = arith.cmpf oeq, %328, %329 : vector<8x8xf32>
      %cst_164 = arith.constant -1.000000e+04 : f32
      %331 = vector.broadcast %cst_164 : f32 to vector<8x8xf32>
      %332 = arith.select %330, %331, %328 : vector<8x8xi1>, vector<8x8xf32>
      %333 = arith.addf %332, %225 : vector<8x8xf32>
      %cst_165 = arith.constant dense<0xFF800000> : vector<8xf32>
      %334 = vector.multi_reduction <maximumf>, %333, %cst_165 [1] : vector<8x8xf32> to vector<8xf32>
      %335 = vector.shape_cast %334 : vector<8xf32> to vector<8x1xf32>
      %336 = vector.broadcast %335 : vector<8x1xf32> to vector<8x8xf32>
      %337 = arith.subf %333, %336 : vector<8x8xf32>
      %338 = math.exp %337 : vector<8x8xf32>
      %cst_166 = arith.constant dense<0.000000e+00> : vector<8xf32>
      %339 = vector.multi_reduction <add>, %338, %cst_166 [1] : vector<8x8xf32> to vector<8xf32>
      %340 = vector.shape_cast %339 : vector<8xf32> to vector<8x1xf32>
      %341 = vector.broadcast %340 : vector<8x1xf32> to vector<8x8xf32>
      %342 = arith.divf %338, %341 : vector<8x8xf32>
      %c0_167 = arith.constant 0 : index
      %c0_168 = arith.constant 0 : index
      %343 = vector.load %arg11[%c0_167, %c0_168] : memref<8x8xf32, #tpu.memory_space<vmem>>, vector<8x8xf32>
      tpu.vector_store %arg11[%c0_167, %c0_168], %342 {strides = array<i32>} : memref<8x8xf32, #tpu.memory_space<vmem>>, vector<8x8xf32>,
    } else {
    }
    %c0 = arith.constant 0 : index
    %c0_1 = arith.constant 0 : index
    %c0_2 = arith.constant 0 : index
    %c0_3 = arith.constant 0 : index
    %3 = vector.load %arg3[%c0, %c0_1, %c0_2, %c0_3] : memref<1x1x8x24xbf16, #tpu.memory_space<vmem>>, vector<1x1x8x24xbf16>
    %4 = vector.shape_cast %3 : vector<1x1x8x24xbf16> to vector<8x24xbf16>
    %5 = vector.extract_strided_slice %4 {offsets = [0, 0], sizes = [8, 8], strides = [1, 1]} : vector<8x24xbf16> to vector<8x8xbf16>
    %6 = vector.extract_strided_slice %4 {offsets = [0, 8], sizes = [8, 8], strides = [1, 1]} : vector<8x24xbf16> to vector<8x8xbf16>
    %7 = vector.extract_strided_slice %4 {offsets = [0, 16], sizes = [8, 8], strides = [1, 1]} : vector<8x24xbf16> to vector<8x8xbf16>
    %c0_4 = arith.constant 0 : index
    %c0_5 = arith.constant 0 : index
    %8 = vector.load %arg6[%c0_4, %c0_5] : memref<10x8xbf16, #tpu.memory_space<vmem>>, vector<10x8xbf16>
    %c0_6 = arith.constant 0 : index
    %c0_7 = arith.constant 0 : index
    %9 = vector.load %arg7[%c0_6, %c0_7] : memref<10x8xbf16, #tpu.memory_space<vmem>>, vector<10x8xbf16>
    %10 = arith.extf %9 : vector<10x8xbf16> to vector<10x8xf32>
    %cst = arith.constant dense<0.000000e+00> : vector<8x8xf32>
    %11 = tpu.matmul %5, %6, %cst {dimension_numbers = #tpu.dot_dimension_numbers<[1], [1], [0], [0], [0, 0, 1, 0], [], []>} : vector<8x8xbf16>, vector<8x8xbf16>, vector<8x8xf32> -> vector<8x8xf32>
    %cst_8 = arith.constant dense<0.000000e+00> : vector<8x10xf32>
    %12 = tpu.matmul %5, %8, %cst_8 {dimension_numbers = #tpu.dot_dimension_numbers<[1], [1], [0], [0], [0, 0, 1, 0], [], []>} : vector<8x8xbf16>, vector<10x8xbf16>, vector<8x10xf32> -> vector<8x10xf32>
    %cst_9 = arith.constant 0.000000e+00 : f32
    %13 = vector.broadcast %cst_9 : f32 to vector<8x8xf32>
    %c0_10 = arith.constant 0 : index
    %c0_11 = arith.constant 0 : index
    %c0_12 = arith.constant 0 : index
    %14 = vector.load %arg13[%c0_10, %c0_11, %c0_12] : memref<10x8x8xf32, #tpu.memory_space<vmem>>, vector<1x8x8xf32>
    %15 = vector.shape_cast %14 : vector<1x8x8xf32> to vector<8x8xf32>
    %16 = vector.extract_strided_slice %12 {offsets = [0, 0], sizes = [8, 1], strides = [1, 1]} : vector<8x10xf32> to vector<8x1xf32>
    %17 = vector.broadcast %16 : vector<8x1xf32> to vector<8x8xf32>
    %18 = arith.mulf %15, %17 : vector<8x8xf32>
    %19 = arith.addf %13, %18 : vector<8x8xf32>
    %c1 = arith.constant 1 : index
    %c0_13 = arith.constant 0 : index
    %c0_14 = arith.constant 0 : index
    %20 = vector.load %arg13[%c1, %c0_13, %c0_14] : memref<10x8x8xf32, #tpu.memory_space<vmem>>, vector<1x8x8xf32>
    %21 = vector.shape_cast %20 : vector<1x8x8xf32> to vector<8x8xf32>
    %22 = vector.extract_strided_slice %12 {offsets = [0, 1], sizes = [8, 1], strides = [1, 1]} : vector<8x10xf32> to vector<8x1xf32>
    %23 = vector.broadcast %22 : vector<8x1xf32> to vector<8x8xf32>
    %24 = arith.mulf %21, %23 : vector<8x8xf32>
    %25 = arith.addf %19, %24 : vector<8x8xf32>
    %c2 = arith.constant 2 : index
    %c0_15 = arith.constant 0 : index
    %c0_16 = arith.constant 0 : index
    %26 = vector.load %arg13[%c2, %c0_15, %c0_16] : memref<10x8x8xf32, #tpu.memory_space<vmem>>, vector<1x8x8xf32>
    %27 = vector.shape_cast %26 : vector<1x8x8xf32> to vector<8x8xf32>
    %28 = vector.extract_strided_slice %12 {offsets = [0, 2], sizes = [8, 1], strides = [1, 1]} : vector<8x10xf32> to vector<8x1xf32>
    %29 = vector.broadcast %28 : vector<8x1xf32> to vector<8x8xf32>
    %30 = arith.mulf %27, %29 : vector<8x8xf32>
    %31 = arith.addf %25, %30 : vector<8x8xf32>
    %c3 = arith.constant 3 : index
    %c0_17 = arith.constant 0 : index
    %c0_18 = arith.constant 0 : index
    %32 = vector.load %arg13[%c3, %c0_17, %c0_18] : memref<10x8x8xf32, #tpu.memory_space<vmem>>, vector<1x8x8xf32>
    %33 = vector.shape_cast %32 : vector<1x8x8xf32> to vector<8x8xf32>
    %34 = vector.extract_strided_slice %12 {offsets = [0, 3], sizes = [8, 1], strides = [1, 1]} : vector<8x10xf32> to vector<8x1xf32>
    %35 = vector.broadcast %34 : vector<8x1xf32> to vector<8x8xf32>
    %36 = arith.mulf %33, %35 : vector<8x8xf32>
    %37 = arith.addf %31, %36 : vector<8x8xf32>
    %c4 = arith.constant 4 : index
    %c0_19 = arith.constant 0 : index
    %c0_20 = arith.constant 0 : index
    %38 = vector.load %arg13[%c4, %c0_19, %c0_20] : memref<10x8x8xf32, #tpu.memory_space<vmem>>, vector<1x8x8xf32>
    %39 = vector.shape_cast %38 : vector<1x8x8xf32> to vector<8x8xf32>
    %40 = vector.extract_strided_slice %12 {offsets = [0, 4], sizes = [8, 1], strides = [1, 1]} : vector<8x10xf32> to vector<8x1xf32>
    %41 = vector.broadcast %40 : vector<8x1xf32> to vector<8x8xf32>
    %42 = arith.mulf %39, %41 : vector<8x8xf32>
    %43 = arith.addf %37, %42 : vector<8x8xf32>
    %c5 = arith.constant 5 : index
    %c0_21 = arith.constant 0 : index
    %c0_22 = arith.constant 0 : index
    %44 = vector.load %arg13[%c5, %c0_21, %c0_22] : memref<10x8x8xf32, #tpu.memory_space<vmem>>, vector<1x8x8xf32>
    %45 = vector.shape_cast %44 : vector<1x8x8xf32> to vector<8x8xf32>
    %46 = vector.extract_strided_slice %12 {offsets = [0, 5], sizes = [8, 1], strides = [1, 1]} : vector<8x10xf32> to vector<8x1xf32>
    %47 = vector.broadcast %46 : vector<8x1xf32> to vector<8x8xf32>
    %48 = arith.mulf %45, %47 : vector<8x8xf32>
    %49 = arith.addf %43, %48 : vector<8x8xf32>
    %c6 = arith.constant 6 : index
    %c0_23 = arith.constant 0 : index
    %c0_24 = arith.constant 0 : index
    %50 = vector.load %arg13[%c6, %c0_23, %c0_24] : memref<10x8x8xf32, #tpu.memory_space<vmem>>, vector<1x8x8xf32>
    %51 = vector.shape_cast %50 : vector<1x8x8xf32> to vector<8x8xf32>
    %52 = vector.extract_strided_slice %12 {offsets = [0, 6], sizes = [8, 1], strides = [1, 1]} : vector<8x10xf32> to vector<8x1xf32>
    %53 = vector.broadcast %52 : vector<8x1xf32> to vector<8x8xf32>
    %54 = arith.mulf %51, %53 : vector<8x8xf32>
    %55 = arith.addf %49, %54 : vector<8x8xf32>
    %c7 = arith.constant 7 : index
    %c0_25 = arith.constant 0 : index
    %c0_26 = arith.constant 0 : index
    %56 = vector.load %arg13[%c7, %c0_25, %c0_26] : memref<10x8x8xf32, #tpu.memory_space<vmem>>, vector<1x8x8xf32>
    %57 = vector.shape_cast %56 : vector<1x8x8xf32> to vector<8x8xf32>
    %58 = vector.extract_strided_slice %12 {offsets = [0, 7], sizes = [8, 1], strides = [1, 1]} : vector<8x10xf32> to vector<8x1xf32>
    %59 = vector.broadcast %58 : vector<8x1xf32> to vector<8x8xf32>
    %60 = arith.mulf %57, %59 : vector<8x8xf32>
    %61 = arith.addf %55, %60 : vector<8x8xf32>
    %c8 = arith.constant 8 : index
    %c0_27 = arith.constant 0 : index
    %c0_28 = arith.constant 0 : index
    %62 = vector.load %arg13[%c8, %c0_27, %c0_28] : memref<10x8x8xf32, #tpu.memory_space<vmem>>, vector<1x8x8xf32>
    %63 = vector.shape_cast %62 : vector<1x8x8xf32> to vector<8x8xf32>
    %64 = vector.extract_strided_slice %12 {offsets = [0, 8], sizes = [8, 1], strides = [1, 1]} : vector<8x10xf32> to vector<8x1xf32>
    %65 = vector.broadcast %64 : vector<8x1xf32> to vector<8x8xf32>
    %66 = arith.mulf %63, %65 : vector<8x8xf32>
    %67 = arith.addf %61, %66 : vector<8x8xf32>
    %c9 = arith.constant 9 : index
    %c0_29 = arith.constant 0 : index
    %c0_30 = arith.constant 0 : index
    %68 = vector.load %arg13[%c9, %c0_29, %c0_30] : memref<10x8x8xf32, #tpu.memory_space<vmem>>, vector<1x8x8xf32>
    %69 = vector.shape_cast %68 : vector<1x8x8xf32> to vector<8x8xf32>
    %70 = vector.extract_strided_slice %12 {offsets = [0, 9], sizes = [8, 1], strides = [1, 1]} : vector<8x10xf32> to vector<8x1xf32>
    %71 = vector.broadcast %70 : vector<8x1xf32> to vector<8x8xf32>
    %72 = arith.mulf %69, %71 : vector<8x8xf32>
    %73 = arith.addf %67, %72 : vector<8x8xf32>
    %74 = arith.addf %11, %73 : vector<8x8xf32>
    %cst_31 = arith.constant 0.353553385 : f32
    %75 = vector.broadcast %cst_31 : f32 to vector<8x8xf32>
    %76 = arith.mulf %74, %75 : vector<8x8xf32>
    %c0_32 = arith.constant 0 : index
    %c0_33 = arith.constant 0 : index
    %77 = vector.load %arg12[%c0_32, %c0_33] : memref<8x8xf32, #tpu.memory_space<vmem>>, vector<8x8xf32>
    %78 = arith.addf %76, %77 : vector<8x8xf32>
    %cst_34 = arith.constant dense<0xFF800000> : vector<8xf32>
    %79 = vector.multi_reduction <maximumf>, %78, %cst_34 [1] : vector<8x8xf32> to vector<8xf32>
    %80 = vector.shape_cast %79 : vector<8xf32> to vector<8x1xf32>
    %81 = vector.broadcast %80 : vector<8x1xf32> to vector<8x8xf32>
    %82 = arith.subf %78, %81 : vector<8x8xf32>
    %83 = math.exp %82 : vector<8x8xf32>
    %cst_35 = arith.constant dense<0.000000e+00> : vector<8xf32>
    %84 = vector.multi_reduction <add>, %83, %cst_35 [1] : vector<8x8xf32> to vector<8xf32>
    %85 = vector.shape_cast %84 : vector<8xf32> to vector<8x1xf32>
    %86 = vector.broadcast %85 : vector<8x1xf32> to vector<8x8xf32>
    %87 = arith.divf %83, %86 : vector<8x8xf32>
    %c0_36 = arith.constant 0 : index
    %88 = memref.load %arg2[%c0_36] : memref<2xf32, #tpu.memory_space<smem>>
    %c1_37 = arith.constant 1 : index
    %89 = memref.load %arg2[%c1_37] : memref<2xf32, #tpu.memory_space<smem>>
    %cst_38 = arith.constant 1.000000e+00 : f32
    %90 = arith.subf %cst_38, %88 : f32
    %cst_39 = arith.constant 1.000000e+00 : f32
    %91 = arith.subf %cst_39, %89 : f32
    %92 = arith.mulf %90, %91 : f32
    %cst_40 = arith.constant 1.000000e+00 : f32
    %93 = arith.subf %cst_40, %88 : f32
    %94 = arith.mulf %93, %89 : f32
    %95 = vector.broadcast %92 : f32 to vector<8x8xf32>
    %96 = arith.mulf %95, %87 : vector<8x8xf32>
    %c0_41 = arith.constant 0 : index
    %c0_42 = arith.constant 0 : index
    %97 = vector.load %arg10[%c0_41, %c0_42] : memref<8x8xf32, #tpu.memory_space<vmem>>, vector<8x8xf32>
    %98 = vector.broadcast %94 : f32 to vector<8x8xf32>
    %99 = arith.mulf %98, %97 : vector<8x8xf32>
    %100 = arith.addf %96, %99 : vector<8x8xf32>
    %c0_43 = arith.constant 0 : index
    %c0_44 = arith.constant 0 : index
    %101 = vector.load %arg11[%c0_43, %c0_44] : memref<8x8xf32, #tpu.memory_space<vmem>>, vector<8x8xf32>
    %102 = vector.broadcast %88 : f32 to vector<8x8xf32>
    %103 = arith.mulf %102, %101 : vector<8x8xf32>
    %104 = arith.addf %100, %103 : vector<8x8xf32>
    %105 = arith.truncf %104 : vector<8x8xf32> to vector<8x8xbf16>
    %c0_45 = arith.constant 0 : index
    %c0_46 = arith.constant 0 : index
    %c0_47 = arith.constant 0 : index
    %c0_48 = arith.constant 0 : index
    %106 = vector.load %arg9[%c0_45, %c0_46, %c0_47, %c0_48] : memref<1x1x8x8xbf16, #tpu.memory_space<vmem>>, vector<1x1x8x8xbf16>
    %107 = vector.shape_cast %106 : vector<1x1x8x8xbf16> to vector<8x8xbf16>
    %108 = vector.shape_cast %105 : vector<8x8xbf16> to vector<1x1x8x8xbf16>
    tpu.vector_store %arg9[%c0_45, %c0_46, %c0_47, %c0_48], %108 {strides = array<i32>} : memref<1x1x8x8xbf16, #tpu.memory_space<vmem>>, vector<1x1x8x8xbf16>,
    %109 = arith.truncf %104 : vector<8x8xf32> to vector<8x8xbf16>
    %cst_49 = arith.constant dense<0.000000e+00> : vector<8x8xf32>
    %110 = tpu.matmul %109, %7, %cst_49 {dimension_numbers = #tpu.dot_dimension_numbers<[1], [0], [0], [1], [0, 0, 1, 1], [], []>} : vector<8x8xbf16>, vector<8x8xbf16>, vector<8x8xf32> -> vector<8x8xf32>
    %c0_50 = arith.constant 0 : index
    %c0_51 = arith.constant 0 : index
    %c0_52 = arith.constant 0 : index
    %111 = vector.load %arg13[%c0_50, %c0_51, %c0_52] : memref<10x8x8xf32, #tpu.memory_space<vmem>>, vector<1x8x8xf32>
    %112 = vector.shape_cast %111 : vector<1x8x8xf32> to vector<8x8xf32>
    %113 = arith.mulf %112, %104 : vector<8x8xf32>
    %cst_53 = arith.constant dense<0.000000e+00> : vector<8xf32>
    %114 = vector.multi_reduction <add>, %113, %cst_53 [1] : vector<8x8xf32> to vector<8xf32>
    %115 = vector.shape_cast %114 : vector<8xf32> to vector<8x1xf32>
    %116 = vector.extract_strided_slice %10 {offsets = [0, 0], sizes = [1, 8], strides = [1, 1]} : vector<10x8xf32> to vector<1x8xf32>
    %117 = vector.broadcast %115 : vector<8x1xf32> to vector<8x8xf32>
    %118 = vector.broadcast %116 : vector<1x8xf32> to vector<8x8xf32>
    %119 = arith.mulf %117, %118 : vector<8x8xf32>
    %120 = arith.addf %110, %119 : vector<8x8xf32>
    %c1_54 = arith.constant 1 : index
    %c0_55 = arith.constant 0 : index
    %c0_56 = arith.constant 0 : index
    %121 = vector.load %arg13[%c1_54, %c0_55, %c0_56] : memref<10x8x8xf32, #tpu.memory_space<vmem>>, vector<1x8x8xf32>
    %122 = vector.shape_cast %121 : vector<1x8x8xf32> to vector<8x8xf32>
    %123 = arith.mulf %122, %104 : vector<8x8xf32>
    %cst_57 = arith.constant dense<0.000000e+00> : vector<8xf32>
    %124 = vector.multi_reduction <add>, %123, %cst_57 [1] : vector<8x8xf32> to vector<8xf32>
    %125 = vector.shape_cast %124 : vector<8xf32> to vector<8x1xf32>
    %126 = vector.extract_strided_slice %10 {offsets = [1, 0], sizes = [1, 8], strides = [1, 1]} : vector<10x8xf32> to vector<1x8xf32>
    %127 = vector.broadcast %125 : vector<8x1xf32> to vector<8x8xf32>
    %128 = vector.broadcast %126 : vector<1x8xf32> to vector<8x8xf32>
    %129 = arith.mulf %127, %128 : vector<8x8xf32>
    %130 = arith.addf %120, %129 : vector<8x8xf32>
    %c2_58 = arith.constant 2 : index
    %c0_59 = arith.constant 0 : index
    %c0_60 = arith.constant 0 : index
    %131 = vector.load %arg13[%c2_58, %c0_59, %c0_60] : memref<10x8x8xf32, #tpu.memory_space<vmem>>, vector<1x8x8xf32>
    %132 = vector.shape_cast %131 : vector<1x8x8xf32> to vector<8x8xf32>
    %133 = arith.mulf %132, %104 : vector<8x8xf32>
    %cst_61 = arith.constant dense<0.000000e+00> : vector<8xf32>
    %134 = vector.multi_reduction <add>, %133, %cst_61 [1] : vector<8x8xf32> to vector<8xf32>
    %135 = vector.shape_cast %134 : vector<8xf32> to vector<8x1xf32>
    %136 = vector.extract_strided_slice %10 {offsets = [2, 0], sizes = [1, 8], strides = [1, 1]} : vector<10x8xf32> to vector<1x8xf32>
    %137 = vector.broadcast %135 : vector<8x1xf32> to vector<8x8xf32>
    %138 = vector.broadcast %136 : vector<1x8xf32> to vector<8x8xf32>
    %139 = arith.mulf %137, %138 : vector<8x8xf32>
    %140 = arith.addf %130, %139 : vector<8x8xf32>
    %c3_62 = arith.constant 3 : index
    %c0_63 = arith.constant 0 : index
    %c0_64 = arith.constant 0 : index
    %141 = vector.load %arg13[%c3_62, %c0_63, %c0_64] : memref<10x8x8xf32, #tpu.memory_space<vmem>>, vector<1x8x8xf32>
    %142 = vector.shape_cast %141 : vector<1x8x8xf32> to vector<8x8xf32>
    %143 = arith.mulf %142, %104 : vector<8x8xf32>
    %cst_65 = arith.constant dense<0.000000e+00> : vector<8xf32>
    %144 = vector.multi_reduction <add>, %143, %cst_65 [1] : vector<8x8xf32> to vector<8xf32>
    %145 = vector.shape_cast %144 : vector<8xf32> to vector<8x1xf32>
    %146 = vector.extract_strided_slice %10 {offsets = [3, 0], sizes = [1, 8], strides = [1, 1]} : vector<10x8xf32> to vector<1x8xf32>
    %147 = vector.broadcast %145 : vector<8x1xf32> to vector<8x8xf32>
    %148 = vector.broadcast %146 : vector<1x8xf32> to vector<8x8xf32>
    %149 = arith.mulf %147, %148 : vector<8x8xf32>
    %150 = arith.addf %140, %149 : vector<8x8xf32>
    %c4_66 = arith.constant 4 : index
    %c0_67 = arith.constant 0 : index
    %c0_68 = arith.constant 0 : index
    %151 = vector.load %arg13[%c4_66, %c0_67, %c0_68] : memref<10x8x8xf32, #tpu.memory_space<vmem>>, vector<1x8x8xf32>
    %152 = vector.shape_cast %151 : vector<1x8x8xf32> to vector<8x8xf32>
    %153 = arith.mulf %152, %104 : vector<8x8xf32>
    %cst_69 = arith.constant dense<0.000000e+00> : vector<8xf32>
    %154 = vector.multi_reduction <add>, %153, %cst_69 [1] : vector<8x8xf32> to vector<8xf32>
    %155 = vector.shape_cast %154 : vector<8xf32> to vector<8x1xf32>
    %156 = vector.extract_strided_slice %10 {offsets = [4, 0], sizes = [1, 8], strides = [1, 1]} : vector<10x8xf32> to vector<1x8xf32>
    %157 = vector.broadcast %155 : vector<8x1xf32> to vector<8x8xf32>
    %158 = vector.broadcast %156 : vector<1x8xf32> to vector<8x8xf32>
    %159 = arith.mulf %157, %158 : vector<8x8xf32>
    %160 = arith.addf %150, %159 : vector<8x8xf32>
    %c5_70 = arith.constant 5 : index
    %c0_71 = arith.constant 0 : index
    %c0_72 = arith.constant 0 : index
    %161 = vector.load %arg13[%c5_70, %c0_71, %c0_72] : memref<10x8x8xf32, #tpu.memory_space<vmem>>, vector<1x8x8xf32>
    %162 = vector.shape_cast %161 : vector<1x8x8xf32> to vector<8x8xf32>
    %163 = arith.mulf %162, %104 : vector<8x8xf32>
    %cst_73 = arith.constant dense<0.000000e+00> : vector<8xf32>
    %164 = vector.multi_reduction <add>, %163, %cst_73 [1] : vector<8x8xf32> to vector<8xf32>
    %165 = vector.shape_cast %164 : vector<8xf32> to vector<8x1xf32>
    %166 = vector.extract_strided_slice %10 {offsets = [5, 0], sizes = [1, 8], strides = [1, 1]} : vector<10x8xf32> to vector<1x8xf32>
    %167 = vector.broadcast %165 : vector<8x1xf32> to vector<8x8xf32>
    %168 = vector.broadcast %166 : vector<1x8xf32> to vector<8x8xf32>
    %169 = arith.mulf %167, %168 : vector<8x8xf32>
    %170 = arith.addf %160, %169 : vector<8x8xf32>
    %c6_74 = arith.constant 6 : index
    %c0_75 = arith.constant 0 : index
    %c0_76 = arith.constant 0 : index
    %171 = vector.load %arg13[%c6_74, %c0_75, %c0_76] : memref<10x8x8xf32, #tpu.memory_space<vmem>>, vector<1x8x8xf32>
    %172 = vector.shape_cast %171 : vector<1x8x8xf32> to vector<8x8xf32>
    %173 = arith.mulf %172, %104 : vector<8x8xf32>
    %cst_77 = arith.constant dense<0.000000e+00> : vector<8xf32>
    %174 = vector.multi_reduction <add>, %173, %cst_77 [1] : vector<8x8xf32> to vector<8xf32>
    %175 = vector.shape_cast %174 : vector<8xf32> to vector<8x1xf32>
    %176 = vector.extract_strided_slice %10 {offsets = [6, 0], sizes = [1, 8], strides = [1, 1]} : vector<10x8xf32> to vector<1x8xf32>
    %177 = vector.broadcast %175 : vector<8x1xf32> to vector<8x8xf32>
    %178 = vector.broadcast %176 : vector<1x8xf32> to vector<8x8xf32>
    %179 = arith.mulf %177, %178 : vector<8x8xf32>
    %180 = arith.addf %170, %179 : vector<8x8xf32>
    %c7_78 = arith.constant 7 : index
    %c0_79 = arith.constant 0 : index
    %c0_80 = arith.constant 0 : index
    %181 = vector.load %arg13[%c7_78, %c0_79, %c0_80] : memref<10x8x8xf32, #tpu.memory_space<vmem>>, vector<1x8x8xf32>
    %182 = vector.shape_cast %181 : vector<1x8x8xf32> to vector<8x8xf32>
    %183 = arith.mulf %182, %104 : vector<8x8xf32>
    %cst_81 = arith.constant dense<0.000000e+00> : vector<8xf32>
    %184 = vector.multi_reduction <add>, %183, %cst_81 [1] : vector<8x8xf32> to vector<8xf32>
    %185 = vector.shape_cast %184 : vector<8xf32> to vector<8x1xf32>
    %186 = vector.extract_strided_slice %10 {offsets = [7, 0], sizes = [1, 8], strides = [1, 1]} : vector<10x8xf32> to vector<1x8xf32>
    %187 = vector.broadcast %185 : vector<8x1xf32> to vector<8x8xf32>
    %188 = vector.broadcast %186 : vector<1x8xf32> to vector<8x8xf32>
    %189 = arith.mulf %187, %188 : vector<8x8xf32>
    %190 = arith.addf %180, %189 : vector<8x8xf32>
    %c8_82 = arith.constant 8 : index
    %c0_83 = arith.constant 0 : index
    %c0_84 = arith.constant 0 : index
    %191 = vector.load %arg13[%c8_82, %c0_83, %c0_84] : memref<10x8x8xf32, #tpu.memory_space<vmem>>, vector<1x8x8xf32>
    %192 = vector.shape_cast %191 : vector<1x8x8xf32> to vector<8x8xf32>
    %193 = arith.mulf %192, %104 : vector<8x8xf32>
    %cst_85 = arith.constant dense<0.000000e+00> : vector<8xf32>
    %194 = vector.multi_reduction <add>, %193, %cst_85 [1] : vector<8x8xf32> to vector<8xf32>
    %195 = vector.shape_cast %194 : vector<8xf32> to vector<8x1xf32>
    %196 = vector.extract_strided_slice %10 {offsets = [8, 0], sizes = [1, 8], strides = [1, 1]} : vector<10x8xf32> to vector<1x8xf32>
    %197 = vector.broadcast %195 : vector<8x1xf32> to vector<8x8xf32>
    %198 = vector.broadcast %196 : vector<1x8xf32> to vector<8x8xf32>
    %199 = arith.mulf %197, %198 : vector<8x8xf32>
    %200 = arith.addf %190, %199 : vector<8x8xf32>
    %c9_86 = arith.constant 9 : index
    %c0_87 = arith.constant 0 : index
    %c0_88 = arith.constant 0 : index
    %201 = vector.load %arg13[%c9_86, %c0_87, %c0_88] : memref<10x8x8xf32, #tpu.memory_space<vmem>>, vector<1x8x8xf32>
    %202 = vector.shape_cast %201 : vector<1x8x8xf32> to vector<8x8xf32>
    %203 = arith.mulf %202, %104 : vector<8x8xf32>
    %cst_89 = arith.constant dense<0.000000e+00> : vector<8xf32>
    %204 = vector.multi_reduction <add>, %203, %cst_89 [1] : vector<8x8xf32> to vector<8xf32>
    %205 = vector.shape_cast %204 : vector<8xf32> to vector<8x1xf32>
    %206 = vector.extract_strided_slice %10 {offsets = [9, 0], sizes = [1, 8], strides = [1, 1]} : vector<10x8xf32> to vector<1x8xf32>
    %207 = vector.broadcast %205 : vector<8x1xf32> to vector<8x8xf32>
    %208 = vector.broadcast %206 : vector<1x8xf32> to vector<8x8xf32>
    %209 = arith.mulf %207, %208 : vector<8x8xf32>
    %210 = arith.addf %200, %209 : vector<8x8xf32>
    %c0_90 = arith.constant 0 : index
    %c0_91 = arith.constant 0 : index
    %c0_92 = arith.constant 0 : index
    %c0_93 = arith.constant 0 : index
    %211 = vector.load %arg8[%c0_90, %c0_91, %c0_92, %c0_93] : memref<1x1x8x8xf32, #tpu.memory_space<vmem>>, vector<1x1x8x8xf32>
    %212 = vector.shape_cast %211 : vector<1x1x8x8xf32> to vector<8x8xf32>
    %213 = vector.shape_cast %210 : vector<8x8xf32> to vector<1x1x8x8xf32>
    tpu.vector_store %arg8[%c0_90, %c0_91, %c0_92, %c0_93], %213 {strides = array<i32>} : memref<1x1x8x8xf32, #tpu.memory_space<vmem>>, vector<1x1x8x8xf32>,
    return
  }
  func.func @transform_0(%arg0: i32, %arg1: i32) -> i32 {
    %c0_i32 = arith.constant 0 : i32
    %c0_i32_0 = arith.constant 0 : i32
    return %c0_i32 : i32
  }
  func.func @transform_1(%arg0: i32, %arg1: i32) -> (i32, i32, i32, i32) {
    %c0_i32 = arith.constant 0 : i32
    %c0_i32_0 = arith.constant 0 : i32
    %c0_i32_1 = arith.constant 0 : i32
    return %arg0, %arg1, %c0_i32, %c0_i32_0 : i32, i32, i32, i32
  }
  func.func @transform_2(%arg0: i32, %arg1: i32) -> (i32, i32, i32) {
    %c0_i32 = arith.constant 0 : i32
    %c0_i32_0 = arith.constant 0 : i32
    %c0_i32_1 = arith.constant 0 : i32
    return %arg0, %c0_i32, %c0_i32_0 : i32, i32, i32
  }
  func.func @transform_3(%arg0: i32, %arg1: i32) -> (i32, i32, i32) {
    %c0_i32 = arith.constant 0 : i32
    %c0_i32_0 = arith.constant 0 : i32
    %c0_i32_1 = arith.constant 0 : i32
    return %arg0, %c0_i32, %c0_i32_0 : i32, i32, i32
  }
  func.func @transform_4(%arg0: i32, %arg1: i32) -> (i32, i32) {
    %c0_i32 = arith.constant 0 : i32
    %c0_i32_0 = arith.constant 0 : i32
    %c0_i32_1 = arith.constant 0 : i32
    return %c0_i32, %c0_i32_0 : i32, i32
  }
  func.func @transform_5(%arg0: i32, %arg1: i32) -> (i32, i32) {
    %c0_i32 = arith.constant 0 : i32
    %c0_i32_0 = arith.constant 0 : i32
    %c0_i32_1 = arith.constant 0 : i32
    return %c0_i32, %c0_i32_0 : i32, i32
  }
  func.func @transform_6(%arg0: i32, %arg1: i32) -> (i32, i32, i32, i32) {
    %c0_i32 = arith.constant 0 : i32
    %c0_i32_0 = arith.constant 0 : i32
    %c0_i32_1 = arith.constant 0 : i32
    return %arg0, %arg1, %c0_i32, %c0_i32_0 : i32, i32, i32, i32
  }
  func.func @transform_7(%arg0: i32, %arg1: i32) -> (i32, i32, i32, i32) {
    %c0_i32 = arith.constant 0 : i32
    %c0_i32_0 = arith.constant 0 : i32
    %c0_i32_1 = arith.constant 0 : i32
    return %arg0, %arg1, %c0_i32, %c0_i32_0 : i32, i32, i32, i32
  }
}

</mosaic_0001>

<bundles_post_ra>
// kernel: ngfkt_forward.2
= control target key start
LH: loop header
LB: loop body
LE: loop exit
PB: predicated region body
PF: predicated region fallthrough
CT: control target
= control target key end

     0   :  { %13 = vsyncpa [#allocation3], 0  ;;  %s926_s0 = inlined_call_operand.hbm [shape: bf16[16,64], index: 0, kind: input, shape index: {}]   ;;  %s927_s1 = inlined_call_operand.hbm [shape: bf16[16,32], index: 1, kind: input, shape index: {}]   ;;  %s928_s2 = inlined_call_operand.hbm [shape: bf16[64,32], index: 2, kind: input, shape index: {}]   ;;  %s929_s3 = inlined_call_operand.hbm [shape: f32[1,32], index: 3, kind: input, shape index: {}]   ;;  %s930_s4 = inlined_call_operand.hbm [shape: bf16[32,32], index: 4, kind: input, shape index: {}]   ;;  %s931_s5 = inlined_call_operand.hbm [shape: f32[1,32], index: 5, kind: input, shape index: {}]   ;;  %s932_s6 = inlined_call_operand.hbm [shape: bf16[32,64], index: 6, kind: input, shape index: {}]   ;;  %s933_s7 = inlined_call_operand.hbm [shape: f32[1,64], index: 7, kind: input, shape index: {}]   ;;  %s934_s8 = inlined_call_operand.hbm [shape: bf16[16,96], index: 8, kind: output, shape index: {}]  }
   0x1   :  { %14 = vsyncpa [#allocation6], 0 }
   0x2   :  { %15 = vsyncpa [#allocation9], 0 }
   0x3   :  { %16 = vsyncpa [#allocation12], 0 }
   0x4   :  { %17 = vsyncpa [#allocation15], 0 }
   0x5   :  { %18 = vsyncpa [#allocation4], 0  ;;  %s714_s27 = smov [#allocation5]   ;;  %s715_s29 = smov [#allocation8]  }
   0x6   :  { %s36_s28 = sshll.u32 %s714_s27, 4  ;;  %s61_s30 = sshll.u32 %s715_s29, 4  ;;  %s37_s28 = int_to_ptr.vmem [resolvable:$true] %s36_s28  ;;  %s773_s30 = int_to_ptr.vmem [resolvable:$true] %s61_s30 }
   0x7   :  { %s504_s11 = scalar_lea.hbm %s927_s1, 128 }
   0x8   :  { %p505_p0 = scmp.ne.s32.totalorder %s927_s1, %s504_s11  ;;  %p508_p1 = scmp.lt.u32.totalorder %s504_s11, %s927_s1 }
   0xa   :  { %p510_p2 = pnand %p508_p1, %p505_p0 }
   0xc   :  { %513 = shalt.err (!%p510_p2)
}
   0xd   :  { %s514_s16 = scalar_lea.vmem %s37_s28, 128  ;;  %p519_p4 = scmp.lt.s32.totalorder %s37_s28, %s37_s28 }
   0xe   :  { %p515_p3 = scmp.ne.s32.totalorder %s37_s28, %s514_s16  ;;  %p520_p5 = scmp.lt.s32.totalorder %s514_s16, %s514_s16 }
  0x10   :  { %p521_p6 = por %p520_p5, %p519_p4 }
  0x12   :  { %p522_p7 = pnand %p521_p6, %p515_p3 }
  0x14   :  { %525 = shalt.err (!%p522_p7)
}
  0x15   :  { %s716_s17 = smov 64   ;;  %s717_s18 = smov 4  }
  0x16   :  { %42 = dma.hbm_to_vmem [thread:$0]  %s927_s1, 128, %s37_s28, [#allocation6], %s716_s17, %s716_s17, %s717_s18  }
  0x17   :  { %s526_s23 = scalar_lea.hbm %s929_s3, 16 }
  0x18   :  { %p527_p8 = scmp.ne.s32.totalorder %s929_s3, %s526_s23  ;;  %p530_p9 = scmp.lt.u32.totalorder %s526_s23, %s929_s3 }
  0x1a   :  { %p532_p10 = pnand %p530_p9, %p527_p8 }
  0x1c   :  { %535 = shalt.err (!%p532_p10)
}
  0x1d   :  { %s536_s29 = scalar_lea.vmem %s773_s30, 16  ;;  %s540_s1 = scalar_lea.vmem %s773_s30, 32 }
  0x1e   :  { %p537_p11 = scmp.ne.s32.totalorder %s773_s30, %s536_s29  ;;  %p541_p12 = scmp.lt.s32.totalorder %s773_s30, %s773_s30 }
  0x1f   :  { %p542_p13 = scmp.lt.s32.totalorder %s540_s1, %s536_s29 }
  0x21   :  { %p543_p0 = por %p542_p13, %p541_p12 }
  0x23   :  { %p544_p1 = pnand %p543_p0, %p537_p11 }
  0x25   :  { %547 = shalt.err (!%p544_p1)
}
  0x26   :  { %64 = dma.hbm_to_vmem [thread:$0]  %s929_s3, 16, %s773_s30, [#allocation9]  }
  0x27   :  { %s718_s10 = smov [#allocation11]   ;;  %s719_s12 = smov [#allocation2]  }
  0x28   :  { %s83_s11 = sshll.u32 %s718_s10, 4  ;;  %s24_s13 = sshll.u32 %s719_s12, 4  ;;  %s84_s11 = int_to_ptr.vmem [resolvable:$true] %s83_s11  ;;  %s808_s13 = int_to_ptr.vmem [resolvable:$true] %s24_s13 }
  0x29   :  { %s548_s16 = scalar_lea.hbm %s931_s5, 16 }
  0x2a   :  { %p549_p2 = scmp.ne.s32.totalorder %s931_s5, %s548_s16  ;;  %p552_p3 = scmp.lt.u32.totalorder %s548_s16, %s931_s5 }
  0x2c   :  { %p554_p4 = pnand %p552_p3, %p549_p2 }
  0x2e   :  { %557 = shalt.err (!%p554_p4)
}
  0x2f   :  { %s558_s3 = scalar_lea.vmem %s84_s11, 16  ;;  %s562_s30 = scalar_lea.vmem %s84_s11, 32 }
  0x30   :  { %p559_p5 = scmp.ne.s32.totalorder %s84_s11, %s558_s3  ;;  %p563_p6 = scmp.lt.s32.totalorder %s84_s11, %s84_s11 }
  0x31   :  { %p564_p7 = scmp.lt.s32.totalorder %s562_s30, %s558_s3 }
  0x33   :  { %p565_p8 = por %p564_p7, %p563_p6 }
  0x35   :  { %p566_p9 = pnand %p565_p8, %p559_p5 }
  0x37   :  { %569 = shalt.err (!%p566_p9)
}
  0x38   :  { %86 = dma.hbm_to_vmem [thread:$0]  %s931_s5, 16, %s84_s11, [#allocation12]  }
  0x39   :  { %s570_s27 = scalar_lea.hbm %s926_s0, 128 }
  0x3a   :  { %p571_p10 = scmp.ne.s32.totalorder %s926_s0, %s570_s27  ;;  %p574_p11 = scmp.lt.u32.totalorder %s570_s27, %s926_s0 }
  0x3c   :  { %p576_p12 = pnand %p574_p11, %p571_p10 }
  0x3e   :  { %579 = shalt.err (!%p576_p12)
}
  0x3f   :  { %s580_s10 = scalar_lea.vmem %s808_s13, 128  ;;  %p585_p0 = scmp.lt.s32.totalorder %s808_s13, %s808_s13 }
  0x40   :  { %p581_p13 = scmp.ne.s32.totalorder %s808_s13, %s580_s10  ;;  %p586_p1 = scmp.lt.s32.totalorder %s580_s10, %s580_s10 }
  0x42   :  { %p587_p2 = por %p586_p1, %p585_p0 }
  0x44   :  { %p588_p3 = pnand %p587_p2, %p581_p13 }
  0x46   :  { %591 = shalt.err (!%p588_p3)
}
  0x47   :  { %30 = dma.hbm_to_vmem [thread:$0]  %s926_s0, 128, %s808_s13, [#allocation3], %s716_s17, %s716_s17, %s717_s18  }
  0x48   :  { %s720_s12 = smov [#allocation7]   ;;  %s721_s15 = smov [#allocation10]  }
  0x49   :  { %s48_s14 = sshll.u32 %s720_s12, 4  ;;  %s70_s16 = sshll.u32 %s721_s15, 4  ;;  %s49_s14 = int_to_ptr.vmem [resolvable:$true] %s48_s14  ;;  %s842_s16 = int_to_ptr.vmem [resolvable:$true] %s70_s16 }
  0x4a   :  { %s592_s21 = scalar_lea.hbm %s928_s2, 512 }
  0x4b   :  { %p593_p4 = scmp.ne.s32.totalorder %s928_s2, %s592_s21  ;;  %p596_p5 = scmp.lt.u32.totalorder %s592_s21, %s928_s2 }
  0x4d   :  { %p598_p6 = pnand %p596_p5, %p593_p4 }
  0x4f   :  { %601 = shalt.err (!%p598_p6)
}
  0x50   :  { %s602_s0 = scalar_lea.vmem %s49_s14, 512  ;;  %p607_p8 = scmp.lt.s32.totalorder %s49_s14, %s49_s14 }
  0x51   :  { %p603_p7 = scmp.ne.s32.totalorder %s49_s14, %s602_s0  ;;  %p608_p9 = scmp.lt.s32.totalorder %s602_s0, %s602_s0 }
  0x53   :  { %p609_p10 = por %p608_p9, %p607_p8 }
  0x55   :  { %p610_p11 = pnand %p609_p10, %p603_p7 }
  0x57   :  { %613 = shalt.err (!%p610_p11)
}
  0x58   :  { %54 = dma.hbm_to_vmem [thread:$0]  %s928_s2, 512, %s49_s14, [#allocation6], %s716_s17, %s716_s17, %s717_s18  }
  0x59   :  { %s614_s27 = scalar_lea.hbm %s930_s4, 256 }
  0x5a   :  { %p615_p12 = scmp.ne.s32.totalorder %s930_s4, %s614_s27  ;;  %p618_p13 = scmp.lt.u32.totalorder %s614_s27, %s930_s4 }
  0x5c   :  { %p620_p0 = pnand %p618_p13, %p615_p12 }
  0x5e   :  { %623 = shalt.err (!%p620_p0)
}
  0x5f   :  { %s624_s10 = scalar_lea.vmem %s842_s16, 256  ;;  %p629_p2 = scmp.lt.s32.totalorder %s842_s16, %s842_s16 }
  0x60   :  { %p625_p1 = scmp.ne.s32.totalorder %s842_s16, %s624_s10  ;;  %p630_p3 = scmp.lt.s32.totalorder %s624_s10, %s624_s10 }
  0x62   :  { %p631_p4 = por %p630_p3, %p629_p2 }
  0x64   :  { %p632_p5 = pnand %p631_p4, %p625_p1 }
  0x66   :  { %635 = shalt.err (!%p632_p5)
}
  0x67   :  { %76 = dma.hbm_to_vmem [thread:$0]  %s930_s4, 256, %s842_s16, [#allocation9], %s716_s17, %s716_s17, %s717_s18  }
  0x68   :  { %s722_s11 = smov [#allocation13]   ;;  %s723_s14 = smov [#allocation14]  }
  0x69   :  { %s92_s12 = sshll.u32 %s722_s11, 4  ;;  %s105_s15 = sshll.u32 %s723_s14, 4  ;;  %s93_s12 = int_to_ptr.vmem [resolvable:$true] %s92_s12  ;;  %s106_s15 = int_to_ptr.vmem [resolvable:$true] %s105_s15 }
  0x6a   :  { %s636_s21 = scalar_lea.hbm %s932_s6, 256 }
  0x6b   :  { %p637_p6 = scmp.ne.s32.totalorder %s932_s6, %s636_s21  ;;  %p640_p7 = scmp.lt.u32.totalorder %s636_s21, %s932_s6 }
  0x6d   :  { %p642_p8 = pnand %p640_p7, %p637_p6 }
  0x6f   :  { %645 = shalt.err (!%p642_p8)
}
  0x70   :  { %s646_s4 = scalar_lea.vmem %s93_s12, 256  ;;  %p651_p10 = scmp.lt.s32.totalorder %s93_s12, %s93_s12 }
  0x71   :  { %p647_p9 = scmp.ne.s32.totalorder %s93_s12, %s646_s4  ;;  %p652_p11 = scmp.lt.s32.totalorder %s646_s4, %s646_s4 }
  0x73   :  { %p653_p12 = por %p652_p11, %p651_p10 }
  0x75   :  { %p654_p13 = pnand %p653_p12, %p647_p9 }
  0x77   :  { %657 = shalt.err (!%p654_p13)
}
  0x78   :  { %98 = dma.hbm_to_vmem [thread:$0]  %s932_s6, 256, %s93_s12, [#allocation12], %s716_s17, %s716_s17, %s717_s18  }
  0x79   :  { %s658_s25 = scalar_lea.hbm %s933_s7, 16 }
  0x7a   :  { %p659_p0 = scmp.ne.s32.totalorder %s933_s7, %s658_s25  ;;  %p662_p1 = scmp.lt.u32.totalorder %s658_s25, %s933_s7 }
  0x7c   :  { %p664_p2 = pnand %p662_p1, %p659_p0 }
  0x7e   :  { %667 = shalt.err (!%p664_p2)
}
  0x7f   :  { %s668_s28 = scalar_lea.vmem %s106_s15, 16  ;;  %s672_s9 = scalar_lea.vmem %s106_s15, 32 }
  0x80   :  { %p669_p3 = scmp.ne.s32.totalorder %s106_s15, %s668_s28  ;;  %p673_p4 = scmp.lt.s32.totalorder %s106_s15, %s106_s15 }
  0x81   :  { %p674_p5 = scmp.lt.s32.totalorder %s672_s9, %s668_s28 }
  0x83   :  { %p675_p6 = por %p674_p5, %p673_p4 }
  0x85   :  { %p676_p7 = pnand %p675_p6, %p669_p3 }
  0x87   :  { %679 = shalt.err (!%p676_p7)
}
  0x88   :  { %108 = dma.hbm_to_vmem [thread:$0]  %s933_s7, 16, %s106_s15, [#allocation15]  }
  0x89   :  { %702 = dma.done.wait [#allocation3], 128  }
  0x8a   :  { %703 = vsyncadd [#allocation3], 4294967168 }
  0x8b   :  { %704 = dma.done.wait [#allocation6], 640  }
  0x8c   :  { %705 = vsyncadd [#allocation6], 4294966656 }
  0x8d   :  { %706 = dma.done.wait [#allocation9], 272  }
  0x8e   :  { %707 = vsyncadd [#allocation9], 4294967024 }
  0x8f   :  { %708 = dma.done.wait [#allocation12], 272  }
  0x90   :  { %709 = vsyncadd [#allocation12], 4294967024 }
  0x91   :  { %710 = dma.done.wait [#allocation15], 16  }
  0x92   :  { %711 = vsyncadd [#allocation15], 4294967280  ;;  %v724_v0 = vmov 0.0   ;;  %vm725_vm0 = vmmov 0   ;;  %v494_v1 = vld [vmem:[#allocation7] sm:$0xff]   ;;  %v495_v2 = vld [vmem:[#allocation7 + $0x8] sm:$0xff]  }
  0x93   :  { %452 = vmatprep.subr.bf16.mxu0 %v724_v0  ;;  %460 = vmatprep.mubr.msk.bf16.mxu0 %vm725_vm0, %v724_v0  ;;  %v499_v3 = vld [vmem:[#allocation10] sm:$0xff]   ;;  %v496_v4 = vld [vmem:[#allocation7 + $0x10] sm:$0xff]   ;;  %v497_v6 = vld [vmem:[#allocation7 + $0x18] sm:$0xff]   ;;  %vm257_vm1 = vcmask 261120   ;;  %vm180_vm2 = vcmask 523264   ;;  %vm378_vm3 = vcmask 257024  }
  0x94   :  { %464 = vmatprep.subr.bf16.mxu1 %v724_v0  ;;  %468 = vmatprep.mubr.msk.bf16.mxu1 %vm725_vm0, %v724_v0  ;;  %v500_v5 = vld [vmem:[#allocation10 + $0x8] sm:$0xff]   ;;  %v501_v7 = vld [vmem:[#allocation5] sm:$0xff]   ;;  %v424_v11 = vld [vmem:[#allocation11] ss:$0 sm:$0xff]  ;;  %s726_s7 = smov 32   ;;  %vm393_vm4 = vcmask 781568  }
  0x95   :  { %453 = vmatpush3.bf16.msra.mxu0 %v494_v1  ;;  %465 = vmatpush3.bf16.msra.mxu1 %v499_v3  ;;  %v498_v8 = vld [vmem:[#allocation2] sm:$0xff]   ;;  %v503_v10 = vld [vmem:[#allocation13 + $0x8] sm:$0xff]   ;;  %v429_v30 = vld [vmem:[#allocation14] ss:$0 sm:$0xff]  ;;  %s727_s2 = smov [#allocation16]  }
  0x96   :  { %454 = vmatprep.subr.bf16.mxu0 %v724_v0  ;;  %466 = vmatprep.subr.bf16.mxu1 %v724_v0  ;;  %v502_v9 = vld [vmem:[#allocation13] sm:$0xff]   ;;  %v417_v13 = vld [vmem:[#allocation8] ss:$0 sm:$0xff]  ;;  %s401_s5 = sshll.u32 %s727_s2, 4  ;;  %s402_s5 = int_to_ptr.vmem [resolvable:$true] %s401_s5 }
  0x97   :  { %s680_s11 = scalar_lea.vmem %s402_s5, 128  ;;  %p685_p9 = scmp.lt.s32.totalorder %s402_s5, %s402_s5 }
  0x98   :  { %p681_p8 = scmp.ne.s32.totalorder %s402_s5, %s680_s11  ;;  %p686_p10 = scmp.lt.s32.totalorder %s680_s11, %s680_s11 }
  0x99   :  { %455 = vmatpush3.bf16.msra.mxu0 %v495_v2  ;;  %467 = vmatpush3.bf16.msra.mxu1 %v500_v5 }
  0x9a   :  { %456 = vmatprep.subr.bf16.mxu0 %v724_v0  ;;  %472 = vmatprep.subr.bf16.mxu1 %v724_v0  ;;  %p687_p11 = por %p686_p10, %p685_p9 }
  0x9c   :  { %469 = vmatmul.mubr.msk.bf16.vlgmr.msra.gmra.mrb[0].mxu1 %vm257_vm1, %v501_v7  ;;  %p688_p12 = pnand %p687_p11, %p681_p8 }
  0x9d   :  { %457 = vmatpush3.bf16.msra.mxu0 %v496_v4  ;;  %476 = vmatprep.mubr.msk.bf16.mxu1 %vm725_vm0, %v724_v0 }
  0x9e   :  { %458 = vmatprep.subr.bf16.mxu0 %v724_v0  ;;  %473 = vmatpush3.bf16.msra.mxu1 %v502_v9 }
  0x9f   :  { %474 = vmatprep.subr.bf16.mxu1 %v724_v0 }
  0xa1   :  { %459 = vmatpush3.bf16.msra.mxu0 %v497_v6 }
  0xa2   :  { %475 = vmatpush3.bf16.msra.mxu1 %v503_v10 }
  0xa4   :  { %461 = vmatmul.mubr.msk.bf16.vlgmr.msra.gmra.mrb[0].mxu0 %vm180_vm2, %v498_v8 }
 0x16f   :  { %v295_v12 = vpop.f32.mrb[0].mxu1 }
 0x170   :  { %v296_v14 = vadd.f32 %v424_v11, %v295_v12  ;;  %v470_v15 = vpop.f32.mrb[1].mxu1 }
 0x171   :  { %v298_v16 = vpop.f32.mrb[2].mxu1 }
 0x172   :  { %v437_v18 = vpack.c.bf16 %v296_v14, %v296_v14  ;;  %v299_v19 = vadd.f32 %v424_v11, %v298_v16  ;;  %v471_v20 = vpop.f32.mrb[3].mxu1 }
 0x174   :  { %379 = vst.msk [vmem:[#allocation16] sm:$0xf] %vm378_vm3, %v437_v18  ;;  %v438_v24 = vpack.c.bf16 %v299_v19, %v299_v19 }
 0x176   :  { %380 = vst.msk [vmem:[#allocation16 + $0x4] sm:$0xf] %vm378_vm3, %v438_v24 }
 0x177   :  { %v218_v17 = vpop.f32.mrb[0].mxu0 }
 0x178   :  { %v219_v21 = vadd.f32 %v417_v13, %v218_v17  ;;  %v462_v22 = vpop.f32.mrb[1].mxu0 }
 0x179   :  { %v221_v23 = vpop.f32.mrb[2].mxu0 }
 0x17a   :  { %v222_v25 = vadd.f32 %v417_v13, %v221_v23  ;;  %v463_v26 = vpop.f32.mrb[3].mxu0  ;;  %v225_v27 = vmax.f32 %v219_v21, 0.0 }
 0x17c   :  { %v226_v28 = vmax.f32 %v222_v25, 0.0 }
 0x17e   :  { %v302_v29 = vpack.c.bf16 %v226_v28, %v225_v27 }
 0x180   :  { %477 = vmatmul.mubr.msk.bf16.vlgmr.msra.gmra.mrb[4].mxu1 %vm257_vm1, %v302_v29 }
 0x253   :  { %v363_v31 = vpop.f32.mrb[4].mxu1 }
 0x254   :  { %v364_v32 = vadd.f32 %v429_v30, %v363_v31  ;;  %v478_v33 = vpop.f32.mrb[5].mxu1 }
 0x255   :  { %v366_v34 = vpop.f32.mrb[6].mxu1 }
 0x256   :  { %v439_v35 = vpack.c.bf16 %v364_v32, %v364_v32  ;;  %v367_v36 = vadd.f32 %v429_v30, %v366_v34  ;;  %v479_v37 = vpop.f32.mrb[7].mxu1 }
 0x258   :  { %387 = vrot.lane.b32.xlu0 %v439_v35, %s726_s7  ;;  %v440_v38 = vpack.c.bf16 %v367_v36, %v367_v36 }
 0x25c   :  { %389 = vrot.lane.b32.xlu0 %v440_v38, %s726_s7 }
 0x2ca   :  { %v388_v39 = vpop.permute.xlu0 %387 }
 0x2cb   :  { %394 = vst.msk [vmem:[#allocation16] sm:$0xf] %vm393_vm4, %v388_v39 }
 0x2ce   :  { %v390_v40 = vpop.permute.xlu0 %389 }
 0x2cf   :  { %395 = vst.msk [vmem:[#allocation16 + $0x4] sm:$0xf] %vm393_vm4, %v390_v40 }
 0x2d0   :  { %691 = shalt.err (!%p688_p12)
}
 0x2d1   :  { %s692_s15 = scalar_lea.hbm %s934_s8, 128 }
 0x2d2   :  { %p693_p13 = scmp.ne.s32.totalorder %s934_s8, %s692_s15  ;;  %p696_p0 = scmp.lt.u32.totalorder %s692_s15, %s934_s8 }
 0x2d4   :  { %p698_p1 = pnand %p696_p0, %p693_p13 }
 0x2d6   :  { %701 = shalt.err (!%p698_p1)
}
 0x2d7   :  { %407 = dma.vmem_to_hbm [thread:$0]  %s402_s5, 128, %s934_s8, [#allocation4], %s716_s17, %s716_s17, %s717_s18  }
 0x2d8   :  { %712 = dma.done.wait [#allocation4], 128  }
 0x2d9   :  { %713 = vsyncadd [#allocation4], 4294967168 }
 0x2da   :  { %411 = vsyncpa [#allocation3], 1 }
 0x2db   :  { %412 = vsyncpa [#allocation6], 1 }
 0x2dc   :  { %413 = vsyncpa [#allocation9], 1 }
 0x2dd   :  { %414 = vsyncpa [#allocation12], 1 }
 0x2de   :  { %415 = vsyncpa [#allocation15], 1 }
 0x2df   :  { %416 = vsyncpa [#allocation4], 1 }

// kernel: ngfkt_forward.3
= control target key start
LH: loop header
LB: loop body
LE: loop exit
PB: predicated region body
PF: predicated region fallthrough
CT: control target
= control target key end

     0   :  { %s2323_s0 = inlined_call_operand.hbm [shape: f32[2], index: 0, kind: input, shape index: {}]   ;;  %s2324_s1 = inlined_call_operand.hbm [shape: bf16[2,4,8,24], index: 1, kind: input, shape index: {}]   ;;  %s2325_s2 = inlined_call_operand.hbm [shape: bf16[2,8,8], index: 2, kind: input, shape index: {}]   ;;  %s2326_s3 = inlined_call_operand.hbm [shape: bf16[2,8,8], index: 3, kind: input, shape index: {}]   ;;  %s2327_s4 = inlined_call_operand.hbm [shape: bf16[10,8], index: 4, kind: input, shape index: {}]   ;;  %s2328_s5 = inlined_call_operand.hbm [shape: bf16[10,8], index: 5, kind: input, shape index: {}]   ;;  %s2329_s6 = inlined_call_operand.hbm [shape: f32[2,4,8,8], index: 6, kind: output, shape index: {0}]   ;;  %s2330_s7 = inlined_call_operand.hbm [shape: bf16[2,4,8,8], index: 7, kind: output, shape index: {1}]  }
   0x1   :  { %2358 = sst [smem:[#allocation36_spill]] %s2323_s0 }
   0x2   :  { %2359 = sst [smem:[#allocation37_spill]] %s2325_s2 }
   0x3   :  { %2360 = sst [smem:[#allocation38_spill]] %s2327_s4 }
   0x4   :  { %2361 = sst [smem:[#allocation39_spill]] %s2328_s5 }
   0x5   :  { %2362 = sst [smem:[#allocation40_spill]] %s2329_s6 }
   0x6   :  { %2363 = sst [smem:[#allocation41_spill]] %s2330_s7 }
   0x7   :  { %13 = vsyncpa [#allocation9], 0 }
   0x8   :  { %14 = vsyncpa [#allocation7], 0 }
   0x9   :  { %16 = vsyncpa [#allocation7 + $0x1], 0 }
   0xa   :  { %17 = vsyncpa [#allocation12], 0 }
   0xb   :  { %19 = vsyncpa [#allocation12 + $0x1], 0 }
   0xc   :  { %20 = vsyncpa [#allocation15], 0 }
   0xd   :  { %21 = vsyncpa [#allocation8], 0 }
   0xe   :  { %23 = vsyncpa [#allocation8 + $0x1], 0 }
   0xf   :  { %24 = vsyncpa [#allocation19], 0 }
  0x10   :  { %26 = vsyncpa [#allocation19 + $0x1], 0  ;;  %s1785_s24 = smov 0   ;;  %s1787_s25 = smov 0  }
  0x11   :  { %s1789_s26 = smov 0   ;;  %s1791_s27 = smov 0  }
  0x12   :  { %s1793_s28 = smov 0   ;;  %s1795_s29 = smov 0  }
  0x13   :  { %s1797_s30 = smov 0   ;;  %s1799_s8 = smov 0  }
  0x14   :  { %s1801_s9 = smov 0   ;;  %s1803_s10 = smov 0  }
  0x15   :  { %s1805_s11 = smov 0  }
  0x16 LB: > { %2364 = sst [smem:[#allocation26_spill]] %s1682_s25  ;;  %s1720_s12 = smov [#allocation14]   ;;  %s1718_s11 = sphi %s1805_s11, %s32_s11   ;;  %s1714_s10 = sphi %s1803_s10, %s2430_s10   ;;  %s1710_s9 = sphi %s1801_s9, %s2429_s9   ;;  %s1706_s8 = sphi %s1799_s8, %s2428_s8   ;;  %s1702_s30 = sphi %s1797_s30, %s2427_s30   ;;  %s1698_s29 = sphi %s1795_s29, %s2426_s29   ;;  %s1694_s28 = sphi %s1793_s28, %s2425_s28   ;;  %s1690_s27 = sphi %s1791_s27, %s2424_s27   ;;  %s1686_s26 = sphi %s1789_s26, %s2423_s26   ;;  %s1682_s25 = sphi %s1787_s25, %s2422_s25   ;;  %s1678_s24 = sphi %s1785_s24, %s2419_s24  }
  0x17   : > { %2365 = sst [smem:[#allocation27_spill]] %s1690_s27  ;;  %s269_s13 = sshll.u32 %s1720_s12, 4  ;;  %s270_s13 = int_to_ptr.vmem [resolvable:$true] %s269_s13 }
  0x18   : > { %2366 = sst [smem:[#allocation28_spill]] %s1702_s30  ;;  %s1841_s14 = sadd.s32 4294967295, %s1718_s11  }
  0x19   : > { %2367 = sst [smem:[#allocation29_spill]] %s1706_s8  ;;  %p1141_p0 = scmp.ge.s32.totalorder %s1718_s11, 1 }
  0x1a   : > { %p248_p1 = scmp.lt.s32.totalorder %s1718_s11, 9  ;;  %p2331_p2 = scmp.eq.s32.totalorder %s1841_s14, 0 }
  0x1b   : > { %s2370_s4 = sld [smem:[#allocation38_spill]] }
  0x1c   : > { %p1846_p3 = pnand %p1141_p0, %p248_p1 }
  0x1e   : > { %s2368_s15 = scalar_select %p1846_p3, 1, 0 }
  0x1f   : > { %p1223_p4 = pneg %p1846_p3 }
  0x21   : > { %p1854_p5 = pnand %p1223_p4, %p2331_p2  ;;  %s1393_s19 = scalar_lea.hbm %s2370_s4, 128 }
  0x22   : > { %p1394_p6 = scmp.ne.s32.totalorder %s2370_s4, %s1393_s19  ;;  %p1400_p10 = scmp.lt.u32.totalorder %s1393_s19, %s2370_s4 }
  0x23   : > { %s2369_s16 = scalar_select %p1854_p5, 1, 0 }
  0x24   : > { %p1866_p7 = pneg %p1854_p5 }
  0x26   : > { %p1396_p8 = pnand %p1866_p7, %p1394_p6 }
  0x28   : > { %p1397_p9 = pneg %p1396_p8 }
  0x2a   : > { %p1402_p11 = pnand %p1400_p10, %p1397_p9 }
  0x2c   : > { %1405 = shalt.err (!%p1402_p11)
}
  0x2d   : > { %s1406_s17 = scalar_lea.vmem %s270_s13, 128  ;;  %p1414_p1 = scmp.lt.s32.totalorder %s270_s13, %s270_s13 }
  0x2e   : > { %p1407_p12 = scmp.ne.s32.totalorder %s270_s13, %s1406_s17  ;;  %p1415_p4 = scmp.lt.s32.totalorder %s1406_s17, %s1406_s17 }
  0x30   : > { %p1409_p13 = pnand %p1407_p12, %p1866_p7  ;;  %p1416_p2 = por %p1415_p4, %p1414_p1 }
  0x32   : > { %p1410_p0 = pneg %p1409_p13 }
  0x34   : > { %p1417_p3 = pnand %p1416_p2, %p1410_p0 }
  0x36   : > { %1420 = shalt.err (!%p1417_p3)
}
  0x37   : > { %s2335_s18 = smov 64   ;;  %s2337_s19 = smov 4  }
  0x38   : > { %1229 = dma.hbm_to_vmem [thread:$0]  (!%p1854_p5), %s2370_s4, 128, %s270_s13, [#allocation15], %s2335_s18, %s2335_s18, %s2337_s19  }
  0x39   : > { %p2339_p2 = scmp.eq.s32.totalorder %s1718_s11, 0  ;;  %p107_p3 = scmp.ne.s32.totalorder %s1686_s26, %s1682_s25 }
  0x3a   : > { %p113_p6 = scmp.ne.s32.totalorder %s1682_s25, %s1678_s24  ;;  %p2338_p8 = scmp.lt.s32.totalorder %s1718_s11, 8 }
  0x3b   : > { %p109_p9 = por %p107_p3, %p2339_p2  ;;  %s316_s23 = sand.u32 1, %s1718_s11  }
  0x3c   : > { %p2372_p10 = scmp.eq.s32.totalorder %s1841_s14, 0  ;;  %s318_s17 = sand.u32 1, %s1686_s26  }
  0x3d   : > { %s2336_s6 = sshll.u32 %s1714_s10, 6  ;;  %s1902_s7 = sshll.u32 %s318_s17, 2 }
  0x3e   : > { %p1896_p11 = por %p113_p6, %p2372_p10  ;;  %s2375_s2 = sld [smem:[#allocation37_spill]] }
  0x3f   : > { %p1913_p12 = pnand %p2338_p8, %p109_p9  ;;  %s320_s17 = scalar_lea.vmem [#allocation11], %s1902_s7 }
  0x40   : > { %s2373_s12 = scalar_select %p1896_p11, 1, 0 }
  0x41   : > { %s2376_s24 = scalar_select %p1913_p12, 1, 0 }
  0x42   : > { %2374 = sst [smem:[#allocation30_spill]] %s2373_s12  ;;  %s327_s18 = sshll.u32 %s320_s17, 4  ;;  %s1919_s18 = int_to_ptr.vmem [resolvable:$true] %s327_s18 }
  0x43   : > { %s1921_s8 = scalar_lea.sflag [#allocation12], %s316_s23  ;;  %p2345_p0 = pneg %p1913_p12 }
  0x44   : > { %s1909_s13 = scalar_lea.hbm %s2375_s2, %s2336_s6  ;;  %s1426_s4 = scalar_lea.hbm %s2375_s2, 128 }
  0x45   : > { %s1421_s20 = scalar_lea.hbm %s1909_s13, 64  ;;  %p1427_p3 = scmp.lt.u32.totalorder %s1909_s13, %s2375_s2 }
  0x46   : > { %p1422_p13 = scmp.ne.s32.totalorder %s1909_s13, %s1421_s20  ;;  %p1428_p6 = scmp.lt.u32.totalorder %s1426_s4, %s1421_s20 }
  0x47   : > { %p1430_p10 = scmp.lt.u32.totalorder %s1421_s20, %s1909_s13 }
  0x48   : > { %p1424_p1 = pnand %p2345_p0, %p1422_p13  ;;  %p1429_p9 = por %p1428_p6, %p1427_p3 }
  0x4a   : > { %p1425_p4 = pneg %p1424_p1  ;;  %p1431_p8 = por %p1430_p10, %p1429_p9 }
  0x4c   : > { %p1432_p2 = pnand %p1431_p8, %p1425_p4 }
  0x4e   : > { %1435 = shalt.err (!%p1432_p2)
}
  0x4f   : > { %s1436_s23 = scalar_lea.vmem %s1919_s18, 64  ;;  %s1723_s6 = smov [#allocation11]  }
  0x50   : > { %p1437_p13 = scmp.ne.s32.totalorder %s1919_s18, %s1436_s23  ;;  %s1441_s19 = sshll.u32 %s1723_s6, 4  ;;  %s1442_s19 = int_to_ptr.vmem [resolvable:$false] %s1441_s19 }
  0x51   : > { %s1443_s30 = scalar_lea.vmem %s1442_s19, 128  ;;  %p1444_p5 = scmp.lt.s32.totalorder %s1919_s18, %s1442_s19 }
  0x52   : > { %p1439_p1 = pnand %p1437_p13, %p2345_p0  ;;  %p1445_p3 = scmp.lt.s32.totalorder %s1443_s30, %s1436_s23 }
  0x54   : > { %p1440_p11 = pneg %p1439_p1  ;;  %p1446_p6 = por %p1445_p3, %p1444_p5 }
  0x56   : > { %p1447_p9 = pnand %p1446_p6, %p1440_p11 }
  0x58   : > { %1450 = shalt.err (!%p1447_p9)
}
  0x59   : > { %1239 = dma.hbm_to_vmem [thread:$0]  (!%p1913_p12), %s1909_s13, 64, %s1919_s18, %s1921_s8  }
  0x5a   : > { %s2377_s0 = sld [smem:[#allocation36_spill]] }
  0x60   : > { %s1451_s17 = scalar_lea.hbm %s2377_s0, 16 }
  0x61   : > { %p1452_p2 = scmp.ne.s32.totalorder %s2377_s0, %s1451_s17  ;;  %p1458_p11 = scmp.lt.u32.totalorder %s1451_s17, %s2377_s0 }
  0x63   : > { %p1454_p8 = pnand %p1452_p2, %p1866_p7 }
  0x65   : > { %p1455_p5 = pneg %p1454_p8 }
  0x67   : > { %p1460_p4 = pnand %p1458_p11, %p1455_p5 }
  0x69   : > { %1463 = shalt.err (!%p1460_p4)
}
  0x6a   : > { %s1724_s30 = smov [#allocation6]   ;;  %p2378_p10 = scmp.ne.s32.totalorder %s2369_s16, 0 }
  0x6b   : > { %s1725_s4 = smov [#allocation16]   ;;  %s2379_s5 = sld [smem:[#allocation39_spill]] }
  0x6c   : > { %1226 = dma.hbm_to_smem (!%p2378_p10), %s2377_s0, 16, %s1724_s30, [#allocation9]  }
  0x6d   : > { %s282_s21 = sshll.u32 %s1725_s4, 4  ;;  %s283_s21 = int_to_ptr.vmem [resolvable:$true] %s282_s21 }
  0x71   : > { %s1464_s2 = scalar_lea.hbm %s2379_s5, 128 }
  0x72   : > { %p1465_p13 = scmp.ne.s32.totalorder %s2379_s5, %s1464_s2  ;;  %p1471_p6 = scmp.lt.u32.totalorder %s1464_s2, %s2379_s5 }
  0x74   : > { %p1467_p1 = pnand %p1465_p13, %p1866_p7 }
  0x76   : > { %p1468_p3 = pneg %p1467_p1 }
  0x78   : > { %p1473_p9 = pnand %p1471_p6, %p1468_p3 }
  0x7a   : > { %1476 = shalt.err (!%p1473_p9)
}
  0x7b   : > { %s1477_s30 = scalar_lea.vmem %s283_s21, 128  ;;  %p1485_p11 = scmp.lt.s32.totalorder %s283_s21, %s283_s21 }
  0x7c   : > { %p1478_p2 = scmp.ne.s32.totalorder %s283_s21, %s1477_s30  ;;  %p1486_p4 = scmp.lt.s32.totalorder %s1477_s30, %s1477_s30 }
  0x7e   : > { %p1480_p8 = pnand %p1478_p2, %p1866_p7  ;;  %p1487_p0 = por %p1486_p4, %p1485_p11 }
  0x80   : > { %p1481_p5 = pneg %p1480_p8 }
  0x82   : > { %p1488_p12 = pnand %p1487_p0, %p1481_p5 }
  0x84   : > { %1491 = shalt.err (!%p1488_p12)
}
  0x85   : > { %s2380_s12 = smov 4   ;;  %s2381_s18 = smov 64  }
  0x86   : > { %1232 = dma.hbm_to_vmem [thread:$0]  (!%p2378_p10), %s2379_s5, 128, %s283_s21, [#allocation15], %s2381_s18, %s2381_s18, %s2380_s12  }
  0x87   : > { %s1140_s16 = sadd.s32 4294967294, %s1718_s11   ;;  %s41_s22 = sadd.s32 1, %s1710_s9 }
  0x88   : > { %s44_s4 = sadd.s32 1, %s1714_s10  ;;  %p42_p7 = scmp.ge.s32.totalorder %s41_s22, 4 }
  0x89   : > { %s74_s20 = sadd.s32 1, %s1698_s29  ;;  %p81_p12 = scmp.ne.s32.totalorder %s1698_s29, %s1694_s28 }
  0x8a   : > { %p87_p0 = scmp.ne.s32.totalorder %s1694_s28, %s1690_s27  ;;  %s2432_s22 = smov (%p42_p7, %s41_s22), 0 }
  0x8b   : > { %2382 = sst [smem:[#allocation31_spill]] %s2432_s22  ;;  %s2434_s4 = smov (!%p42_p7, %s44_s4), %s1714_s10 }
  0x8c   : > { %s70_s6 = ssub.s32 %s1710_s9, %s2432_s22  ;;  %p2383_p13 = scmp.eq.s32.totalorder %s1718_s11, 0 }
  0x8d   : > { %p46_p10 = scmp.ge.s32.totalorder %s2434_s4, 2  ;;  %p2385_p3 = scmp.eq.s32.totalorder %s1841_s14, 0 }
  0x8e   : > { %p2001_p1 = por %p2383_p13, %p81_p12  ;;  %p207_p9 = scmp.eq.s32.totalorder %s1841_s14, 7 }
  0x8f   : > { %p2007_p6 = por %p2385_p3, %p87_p0  ;;  %p213_p2 = scmp.eq.s32.totalorder %s1140_s16, 7 }
  0x90   : > { %s2436_s4 = smov (%p46_p10, %s2434_s4), 0  ;;  %p2014_p8 = por %p207_p9, %p81_p12 }
  0x91   : > { %s2386_s23 = scalar_select %p2007_p6, 1, 0 }
  0x92   : > { %2388 = sst [smem:[#allocation33_spill]] %s2436_s4  ;;  %p2018_p5 = por %p213_p2, %p87_p0 }
  0x93   : > { %2387 = sst [smem:[#allocation32_spill]] %s2386_s23  ;;  %s69_s30 = ssub.s32 %s1714_s10, %s2436_s4 }
  0x94   : > { %s2389_s17 = scalar_select %p2014_p8, 1, 0 }
  0x95   : > { %s2391_s19 = scalar_select %p2018_p5, 1, 0 }
  0x96   : > { %2390 = sst [smem:[#allocation34_spill]] %s2389_s17  ;;  %s296_s12 = sand.u32 1, %s1698_s29  }
  0x97   : > { %2392 = sst [smem:[#allocation35_spill]] %s2391_s19  ;;  %s71_s18 = sor.u32 %s70_s6, %s69_s30 }
  0x98   : > { %p98_p11 = scmp.eq.s32.totalorder %s69_s30, 0  ;;  %p72_p4 = scmp.eq.s32.totalorder %s71_s18, 0 }
  0x99   : > { %s2393_s13 = sadd.s32 1, %s1686_s26  ;;  %s1146_s0 = sshll.u32 %s296_s12, 2 }
  0x9a   : > { %s2028_s2 = scalar_select %p98_p11, %s1686_s26, %s2393_s13  }
  0x9b   : > { %s2031_s16 = scalar_select %p72_p4, %s1698_s29, %s74_s20  }
  0x9c   : > { %s1147_s5 = sshll.u32 %s1714_s10, 2  ;;  %s300_s17 = scalar_lea.vmem [#allocation10], %s1146_s0 }
  0x9d   : > { %s305_s22 = sadd.s32 %s1710_s9, %s1147_s5  ;;  %s309_s19 = sshll.u32 %s300_s17, 4  ;;  %s2040_s19 = int_to_ptr.vmem [resolvable:$true] %s309_s19 }
  0x9e   : > { %s1148_s27 = sshll.u32 %s305_s22, 6  ;;  %p2394_p7 = scmp.lt.s32.totalorder %s1718_s11, 8 }
  0x9f   : > { %s2038_s4 = scalar_lea.hbm %s2324_s1, %s1148_s27  ;;  %s338_s0 = scalar_lea.vmem [#allocation13], %s1902_s7 }
  0xa0   : > { %p2046_p12 = pnand %p2394_p7, %p2001_p1  ;;  %s345_s5 = sshll.u32 %s338_s0, 4  ;;  %s2058_s5 = int_to_ptr.vmem [resolvable:$true] %s345_s5 }
  0xa1   : > { %s2396_s22 = sshll.u32 %s1714_s10, 6  ;;  %s297_s23 = scalar_lea.sflag [#allocation7], %s296_s12 }
  0xa2   : > { %s2056_s6 = scalar_lea.hbm %s2326_s3, %s2396_s22  ;;  %s1492_s21 = scalar_lea.hbm %s2038_s4, 64 }
  0xa3   : > { %p1493_p0 = scmp.ne.s32.totalorder %s2038_s4, %s1492_s21  ;;  %p1494_p13 = pneg %p2046_p12 }
  0xa4   : > { %s1497_s30 = scalar_lea.hbm %s2324_s1, 512  ;;  %p1498_p3 = scmp.lt.u32.totalorder %s2038_s4, %s2324_s1 }
  0xa5   : > { %p1495_p1 = pnand %p1494_p13, %p1493_p0  ;;  %p1499_p9 = scmp.lt.u32.totalorder %s1497_s30, %s1492_s21 }
  0xa6   : > { %p1501_p11 = scmp.lt.u32.totalorder %s1492_s21, %s2038_s4 }
  0xa7   : > { %p1496_p10 = pneg %p1495_p1  ;;  %p1500_p2 = por %p1499_p9, %p1498_p3 }
  0xa9   : > { %p1502_p4 = por %p1501_p11, %p1500_p2 }
  0xab   : > { %p1503_p7 = pnand %p1502_p4, %p1496_p10 }
  0xad   : > { %1506 = shalt.err (!%p1503_p7)
}
  0xae   : > { %s1507_s12 = scalar_lea.vmem %s2040_s19, 64  ;;  %s1726_s0 = smov [#allocation10]  }
  0xaf   : > { %p1508_p0 = scmp.ne.s32.totalorder %s2040_s19, %s1507_s12  ;;  %s1512_s22 = sshll.u32 %s1726_s0, 4  ;;  %s1513_s22 = int_to_ptr.vmem [resolvable:$false] %s1512_s22 }
  0xb0   : > { %s1514_s25 = scalar_lea.vmem %s1513_s22, 128  ;;  %p1515_p8 = scmp.lt.s32.totalorder %s2040_s19, %s1513_s22 }
  0xb1   : > { %p1510_p1 = pnand %p1508_p0, %p1494_p13  ;;  %p1516_p3 = scmp.lt.s32.totalorder %s1514_s25, %s1507_s12 }
  0xb3   : > { %p1511_p5 = pneg %p1510_p1  ;;  %p1517_p9 = por %p1516_p3, %p1515_p8 }
  0xb5   : > { %p1518_p2 = pnand %p1517_p9, %p1511_p5 }
  0xb7   : > { %1521 = shalt.err (!%p1518_p2)
}
  0xb8   : > { %1236 = dma.hbm_to_vmem [thread:$0]  (!%p2046_p12), %s2038_s4, 64, %s2040_s19, %s297_s23  }
  0xb9   : > { %s1522_s27 = scalar_lea.hbm %s2056_s6, 64  ;;  %p2397_p10 = scmp.ne.s32.totalorder %s2376_s24, 0 }
  0xba   : > { %p1523_p13 = scmp.ne.s32.totalorder %s2056_s6, %s1522_s27  ;;  %s1527_s7 = scalar_lea.hbm %s2326_s3, 128 }
  0xbb   : > { %p2398_p11 = pneg %p2397_p10  ;;  %p1528_p8 = scmp.lt.u32.totalorder %s2056_s6, %s2326_s3 }
  0xbc   : > { %p1529_p5 = scmp.lt.u32.totalorder %s1527_s7, %s1522_s27  ;;  %p1531_p1 = scmp.lt.u32.totalorder %s1522_s27, %s2056_s6 }
  0xbd   : > { %p1525_p4 = pnand %p1523_p13, %p2398_p11 }
  0xbe   : > { %p1530_p0 = por %p1529_p5, %p1528_p8 }
  0xbf   : > { %p1526_p7 = pneg %p1525_p4 }
  0xc0   : > { %p1532_p3 = por %p1531_p1, %p1530_p0 }
  0xc2   : > { %p1533_p9 = pnand %p1532_p3, %p1526_p7 }
  0xc4   : > { %1536 = shalt.err (!%p1533_p9)
}
  0xc5   : > { %s1537_s4 = scalar_lea.vmem %s2058_s5, 64  ;;  %p2399_p2 = pmov %p2398_p11 }
  0xc6   : > { %p1538_p12 = scmp.ne.s32.totalorder %s2058_s5, %s1537_s4  ;;  %s1727_s19 = smov [#allocation13]  }
  0xc7   : > { %s1542_s23 = sshll.u32 %s1727_s19, 4  ;;  %s1543_s23 = int_to_ptr.vmem [resolvable:$false] %s1542_s23 }
  0xc8   : > { %p1540_p13 = pnand %p1538_p12, %p2399_p2  ;;  %s1544_s18 = scalar_lea.vmem %s1543_s23, 128 }
  0xc9   : > { %p1545_p4 = scmp.lt.s32.totalorder %s2058_s5, %s1543_s23  ;;  %p1546_p8 = scmp.lt.s32.totalorder %s1544_s18, %s1537_s4 }
  0xca   : > { %p1541_p11 = pneg %p1540_p13 }
  0xcb   : > { %p1547_p5 = por %p1546_p8, %p1545_p4 }
  0xcd   : > { %p1548_p0 = pnand %p1547_p5, %p1541_p11 }
  0xcf   : > { %1551 = shalt.err (!%p1548_p0)
}
  0xd0   : > { %1242 = dma.hbm_to_vmem [thread:$0]  (!%p2397_p10), %s2056_s6, 64, %s2058_s5, %s1921_s8  }
  0xd1   : > { %p2400_p7 = scmp.ne.s32.totalorder %s2368_s15, 0 }
  0xd2   : > { %p2401_p1 = scmp.eq.s32.totalorder (!%p2400_p7), %s1841_s14, 0 }
  0xd3   : > { %354 = sbr.rel (%p2400_p7) target bundleno = 1549 (0x60d), region = 44 }
  0xda   : > { %1653 = dma.done.wait (%p2401_p1), [#allocation9], 16   ;;  %p2402_p3 = pmov %p2401_p1 }
  0xdb   : > { %s2116_s12 = sand.u32 1, %s1694_s28  }
  0xdc   : > { %1655 = vsyncadd (%p2402_p3), [#allocation9], 4294967280  ;;  %s1155_s24 = sshll.u32 %s2116_s12, 2  ;;  %s361_s0 = scalar_lea.sflag [#allocation7], %s2116_s12 }
  0xdd   : > { %s2120_s22 = scalar_lea.vmem [#allocation10], %s1155_s24 }
  0xde   : > { %1657 = dma.done.wait (%p2007_p6), %s361_s0, 64  }
  0xdf   : > { %1659 = vsyncadd (%p2007_p6), %s361_s0, 4294967232  ;;  %s2404_s15 = sld [smem:[#allocation26_spill]]  ;;  %s2405_s8 = sld [smem:[#allocation30_spill]] }
  0xe0   : > { %s369_s5 = sand.u32 1, %s1841_s14  }
  0xe1   : > { %s370_s27 = scalar_lea.sflag [#allocation12], %s369_s5 }
  0xe5   : > { %s371_s6 = sand.u32 1, %s2404_s15   ;;  %p2406_p10 = scmp.ne.s32.totalorder %s2405_s8, 0 }
  0xe6   : > { %s1156_s25 = sshll.u32 %s371_s6, 2 }
  0xe7   : > { %s373_s21 = scalar_lea.vmem [#allocation11], %s1156_s25 }
  0xe8   : > { %1661 = dma.done.wait (%p2406_p10), %s370_s27, 128  }
  0xe9   : > { %1663 = vsyncadd (%p2406_p10), %s370_s27, 4294967168  ;;  %s382_s17 = scalar_lea.vmem [#allocation13], %s1156_s25  ;;  %p2407_p9 = pmov %p2401_p1 }
  0xea   : > { %p2408_p12 = pmov %p2401_p1 }
  0xeb   : > { %1665 = dma.done.wait (%p2407_p9), [#allocation15], 256  }
  0xec   : > { %1667 = vsyncadd (%p2408_p12), [#allocation15], 4294967040 }
  0xed   : > { %395 = sfence }
  0xee   : > { %s1160_s7 = sshll.u32 %s2116_s12, 3  ;;  %s2139_s20 = scalar_lea.vmem [#allocation18], %s1155_s24 }
  0xef   : > { %s2137_s30 = scalar_lea.vmem [#allocation17], %s1160_s7  ;;  %s2409_s4 = sld [smem:[#allocation28_spill]] }
  0xf5   : > { %p1162_p6 = scmp.ne.s32.totalorder %s2409_s4, 0 }
  0xf6   : > { %v444_v0 = vld [vmem:[%s382_s17] sm:$0xf] (!%p1162_p6)  ;;  %v446_v1 = vlaneseq (!%p1162_p6)  ;;  %vm452_vm0 = vcmask (!%p1162_p6), 64512   ;;  %v1728_v3 = vmov (!%p1162_p6), 0.0   ;;  %v442_v8 = vld [vmem:[%s373_s21] sm:$0xf] (!%p1162_p6) }
  0xf7   : > { %441 = sbr.rel (%p1162_p6) target bundleno = 590 (0x24e), region = 72  ;;  %v445_v2 = vunpack.c.l.bf16 (!%p1162_p6), %v444_v0  ;;  %493 = vst.msk [vmem:[#allocation5 + $0x40] sm:$0xff] (!%p1162_p6), %vm452_vm0, %v1728_v3  ;;  %497 = vst.msk [vmem:[#allocation5 + $0x48] sm:$0xff] (!%p1162_p6), %vm452_vm0, %v1728_v3  ;;  %v443_v13 = vunpack.c.l.bf16 (!%p1162_p6), %v442_v8 }
  0xf8   : > { %v447_v4 = vshrl.u32 (!%p1162_p6), %v446_v1, 7  ;;  %v449_v5 = vand.u32 (!%p1162_p6), 127, %v446_v1 }
  0xf9   : > { %v498_v6 = vand.u32 (!%p1162_p6), 2147483647, %v445_v2 }
  0xfa   : > { %vm450_vm1 = vcmp.gt.s32.totalorder (!%p1162_p6), %v449_v5, %v447_v4  ;;  %v454_v7 = vsub.s32 (!%p1162_p6), %v447_v4, %v449_v5 }
  0xfb   : > { %v451_v9 = vsel (!%p1162_p6), %vm450_vm1, -1e+30, %v1728_v3  ;;  %v499_v10 = vsub.f32 (!%p1162_p6), 0.0, %v498_v6  ;;  %v515_v22 = vsel (!%p1162_p6), %vm450_vm1, 0.0, %v443_v13 }
  0xfc   : > { %453 = vst.msk [vmem:[#allocation4] sm:$0xff] (!%p1162_p6), %vm452_vm0, %v451_v9  ;;  %vm455_vm2 = vcmp.gt.s32.totalorder (!%p1162_p6), %v454_v7, 0  ;;  %vm516_vm11 = vcmp.eq.f32.partialorder (!%p1162_p6), %v515_v22, 0.0 }
  0xfd   : > { %v456_v11 = vsel (!%p1162_p6), %vm455_vm2, %v454_v7, 0  ;;  %v500_v12 = vmul.f32 (!%p1162_p6), 1.442695, %v499_v10  ;;  %v517_v23 = vsel (!%p1162_p6), %vm516_vm11, -10000.0, %v515_v22 }
  0xfe   : > { %vm459_vm3 = vcmp.eq.s32.totalorder %v456_v11, 0  ;;  %vm462_vm4 = vcmp.eq.s32.totalorder %v456_v11, 1  ;;  %vm466_vm5 = vcmp.eq.s32.totalorder %v456_v11, 2  ;;  %vm470_vm6 = vcmp.eq.s32.totalorder %v456_v11, 3 }
  0xff   : > { %v460_v14 = vsel %vm459_vm3, 1.0, %v1728_v3  ;;  %v463_v15 = vsel %vm462_vm4, 1.0, %v1728_v3  ;;  %v467_v16 = vsel %vm466_vm5, 1.0, %v1728_v3  ;;  %v471_v17 = vsel %vm470_vm6, 1.0, %v1728_v3 }
 0x100   : > { %461 = vst.msk [vmem:[#allocation5] sm:$0xff] %vm452_vm0, %v460_v14  ;;  %465 = vst.msk [vmem:[#allocation5 + $0x8] sm:$0xff] %vm452_vm0, %v463_v15  ;;  %vm474_vm7 = vcmp.eq.s32.totalorder %v456_v11, 4  ;;  %vm478_vm8 = vcmp.eq.s32.totalorder %v456_v11, 5  ;;  %vm482_vm9 = vcmp.eq.s32.totalorder %v456_v11, 6  ;;  %vm486_vm10 = vcmp.eq.s32.totalorder %v456_v11, 7 }
 0x101   : > { %469 = vst.msk [vmem:[#allocation5 + $0x10] sm:$0xff] %vm452_vm0, %v467_v16  ;;  %473 = vst.msk [vmem:[#allocation5 + $0x18] sm:$0xff] %vm452_vm0, %v471_v17  ;;  %v475_v18 = vsel %vm474_vm7, 1.0, %v1728_v3  ;;  %v479_v19 = vsel %vm478_vm8, 1.0, %v1728_v3  ;;  %v483_v20 = vsel %vm482_vm9, 1.0, %v1728_v3  ;;  %v487_v21 = vsel %vm486_vm10, 1.0, %v1728_v3 }
 0x102   : > { %477 = vst.msk [vmem:[#allocation5 + $0x20] sm:$0xff] %vm452_vm0, %v475_v18  ;;  %481 = vst.msk [vmem:[#allocation5 + $0x28] sm:$0xff] %vm452_vm0, %v479_v19  ;;  %1366 = vpow2.f32 %v500_v12  ;;  %v518_v26 = vadd.f32 %v517_v23, %v451_v9 }
 0x103   : > { %485 = vst.msk [vmem:[#allocation5 + $0x30] sm:$0xff] %vm452_vm0, %v483_v20  ;;  %489 = vst.msk [vmem:[#allocation5 + $0x38] sm:$0xff] %vm452_vm0, %v487_v21 }
 0x104   : > { %v519_v28 = vsel %vm452_vm0, %v518_v26, -inf }
 0x10c   : > { %v1367_v24 = vpop.eup %1366 }
 0x10d   : > { %v502_v25 = vadd.f32 %v1367_v24, %v451_v9 }
 0x10f   : > { %v503_v27 = vsel %vm452_vm0, %v502_v25, -inf }
 0x110   : > { %504 = vmax.xlane.f32.xlu0 %v503_v27 }
 0x114   : > { %520 = vmax.xlane.f32.xlu0 %v519_v28 }
 0x19d   : > { %v505_v29 = vpop.xlane.xlu0 %504 }
 0x19e   : > { %v506_v30 = vsub.f32 %v502_v25, %v505_v29 }
 0x1a0   : > { %v507_v31 = vmul.f32 1.442695, %v506_v30 }
 0x1a1   : > { %v521_v32 = vpop.xlane.xlu0 %520 }
 0x1a2   : > { %1368 = vpow2.f32 %v507_v31  ;;  %v522_v33 = vsub.f32 %v518_v26, %v521_v32 }
 0x1a4   : > { %v523_v34 = vmul.f32 1.442695, %v522_v33 }
 0x1a6   : > { %1370 = vpow2.f32 %v523_v34 }
 0x1ac   : > { %v1369_v35 = vpop.eup %1368 }
 0x1ad   : > { %v509_v36 = vsel %vm452_vm0, %v1369_v35, 0.0 }
 0x1ae   : > { %510 = vadd.xlane.f32.xlu1 %v509_v36 }
 0x1b0   : > { %v1371_v37 = vpop.eup %1370 }
 0x1b1   : > { %v525_v38 = vsel %vm452_vm0, %v1371_v37, 0.0 }
 0x1b2   : > { %526 = vadd.xlane.f32.xlu1 %v525_v38 }
 0x23b   : > { %v511_v39 = vpop.xlane.xlu1 %510 }
 0x23c   : > { %1372 = vrcp.f32 %v511_v39 }
 0x23f   : > { %v527_v40 = vpop.xlane.xlu1 %526 }
 0x240   : > { %1374 = vrcp.f32 %v527_v40 }
 0x246   : > { %v1373_v41 = vpop.eup %1372 }
 0x247   : > { %v513_v42 = vmul.f32 %v1373_v41, %v1369_v35 }
 0x249   : > { %514 = vst.msk [vmem:[#allocation2] sm:$0xff] %vm452_vm0, %v513_v42 }
 0x24a   : > { %v1375_v43 = vpop.eup %1374 }
 0x24b   : > { %v529_v44 = vmul.f32 %v1375_v43, %v1371_v37 }
 0x24d   : > { %530 = vst.msk [vmem:[#allocation3] sm:$0xff] %vm452_vm0, %v529_v44 }
 0x24e PF: > { %vm543_vm12 = vcmask 64512   ;;  %v1729_v45 = vmov 0.0   ;;  %v1387_v46 = vld [vmem:[#allocation14] sm:$0x1f]   ;;  %v531_v47 = vld [vmem:[%s2120_s22] sm:$0xf] }
 0x24f   : > { %1183 = vmatprep.subr.bf16.mxu0 %v1729_v45  ;;  %1189 = vmatprep.subr.bf16.mxu1 %v1729_v45  ;;  %vm1730_vm13 = vmmov 0   ;;  %v2162_v48 = vcombine.low %v531_v47, %v531_v47  ;;  %v548_v49 = vsel %vm543_vm12, %v1387_v46, 0  ;;  %v1731_v50 = vmov 1   ;;  %s1733_s14 = smov 120   ;;  %v2169_v7 = vld [vmem:[#allocation5 + $0x8] sm:$0xff]  ;;  %v2171_v8 = vld [vmem:[#allocation5] sm:$0xff] }
 0x250   : > { %1185 = vmatprep.mubr.msk.bf16.mxu0 %vm1730_vm13, %v1729_v45  ;;  %1191 = vmatprep.mubr.msk.bf16.mxu1 %vm1730_vm13, %v1729_v45  ;;  %v1732_v51 = vmov 0   ;;  %v1734_v58 = vmov 2   ;;  %v1735_v59 = vmov 4   ;;  %v1736_v60 = vmov 3   ;;  %v2173_v10 = vld [vmem:[#allocation5 + $0x10] sm:$0xff]  ;;  %v2178_v15 = vld [vmem:[#allocation5 + $0x18] sm:$0xff] }
 0x251   : > { %1377 = vset.pattern.permute.xlu1 %v1731_v50  ;;  %1376 = vset.pattern.permute.xlu0 %v1732_v51  ;;  %v1737_v61 = vmov 7   ;;  %v1738_v62 = vmov 5   ;;  %v1739_v63 = vmov 9   ;;  %v1740_v0 = vmov 6   ;;  %v2181_v20 = vld [vmem:[#allocation5 + $0x20] sm:$0xff]  ;;  %v2183_v23 = vld [vmem:[#allocation5 + $0x28] sm:$0xff] }
 0x252   : > { %1184 = vmatpush3.bf16.xpose.msra.mxu0 %v548_v49  ;;  %673 = vrot.lane.b32.xlu0 %v2162_v48, %s1733_s14  ;;  %v1741_v1 = vmov 8   ;;  %v2187_v28 = vld [vmem:[#allocation5 + $0x30] sm:$0xff]  ;;  %v2190_v32 = vld [vmem:[#allocation5 + $0x38] sm:$0xff]  ;;  %v2192_v35 = vld [vmem:[#allocation5 + $0x40] sm:$0xff]  ;;  %s1742_s19 = smov 112   ;;  %vm766_vm14 = vcmask 1043456  }
 0x253   : > { %1195 = vmatprep.subr.bf16.mxu0 %v1729_v45  ;;  %v2196_v40 = vld [vmem:[#allocation5 + $0x48] sm:$0xff]  ;;  %v719_v46 = vld [vmem:[#allocation4] sm:$0xff]  ;;  %s732_s23 = sld [smem:[#allocation6]]  ;;  %s1167_s18 = sld [smem:[#allocation6 + $0x1]]  ;;  %vm749_vm15 = vcmask 60416  }
 0x254   : > { %s2410_s15 = sld [smem:[#allocation29_spill]]  ;;  %s2411_s8 = sld [smem:[#allocation28_spill]] }
 0x255   : > { %s2412_s5 = sld [smem:[#allocation34_spill]]  ;;  %s946_s21 = sshll.u32 %s2139_s20, 4  ;;  %s947_s21 = int_to_ptr.vmem [resolvable:$true] %s946_s21 }
 0x256   : > { %s2413_s4 = sld [smem:[#allocation41_spill]] }
 0x259   : > { %1186 = vmatmul.mubr.msk.bf16.vlgmr.msra.gmra.mrb[0].mxu0 %vm543_vm12, %v531_v47  ;;  %s734_s13 = ssub.f32 1.0, %s732_s23 }
 0x25a   : > { %1197 = vmatprep.mubr.msk.bf16.mxu0 %vm1730_vm13, %v1729_v45  ;;  %s735_s24 = ssub.f32 1.0, %s1167_s18  ;;  %s1171_s6 = sshll.u32 %s2410_s15, 2 }
 0x25b   : > { %s737_s0 = smul.f32 %s1167_s18, %s734_s13  ;;  %s2226_s25 = sadd.s32 %s2411_s8, %s1171_s6 }
 0x25c   : > { %s736_s22 = smul.f32 %s735_s24, %s734_s13  ;;  %s1174_s27 = sshll.u32 %s2226_s25, 6 }
 0x25d   : > { %s2233_s14 = scalar_lea.hbm %s2413_s4, %s1174_s27  ;;  %p2414_p13 = scmp.ne.s32.totalorder %s2412_s5, 0 }
 0x25e   : > { %s1743_s18 = smov [#allocation18]  }
 0x25f   : > { %s1556_s13 = sshll.u32 %s1743_s18, 4  ;;  %s1557_s13 = int_to_ptr.vmem [resolvable:$false] %s1556_s13 }
 0x260   : > { %s1558_s24 = scalar_lea.vmem %s1557_s13, 128  ;;  %p1559_p8 = scmp.lt.s32.totalorder %s947_s21, %s1557_s13 }
 0x2c4   : > { %v674_v52 = vpop.permute.xlu0 %673 }
 0x2c5   : > { %v676_v53 = vsel %vm543_vm12, %v674_v52, 0 }
 0x2c6   : > { %1190 = vmatpush3.bf16.xpose.msra.mxu1 %v676_v53 }
 0x2cd   : > { %1192 = vmatmul.mubr.msk.bf16.vlgmr.msra.gmra.mrb[0].mxu1 %vm543_vm12, %v531_v47 }
 0x32c   : > { %v584_v54 = vpop.f32.mrb[0].mxu0 }
 0x32d   : > { %601 = vperm.xlu1 %1377, %v584_v54   ;;  %593 = vperm.xlu0 %1376, %v584_v54   ;;  %v1187_v55 = vpop.f32.mrb[1].mxu0 }
 0x32e   : > { %v587_v56 = vpop.f32.mrb[2].mxu0 }
 0x32f   : > { %v1188_v57 = vpop.f32.mrb[3].mxu0 }
 0x331   : > { %1378 = vset.pattern.permute.xlu1 %v1734_v58  ;;  %1380 = vset.pattern.permute.xlu0 %v1735_v59  ;;  %v741_v59 = vstv %s737_s0 }
 0x332   : > { %609 = vperm.xlu1 %1378, %v584_v54   ;;  %625 = vperm.xlu0 %1380, %v584_v54  }
 0x336   : > { %1379 = vset.pattern.permute.xlu1 %v1736_v60  ;;  %1383 = vset.pattern.permute.xlu0 %v1737_v61  ;;  %v738_v61 = vstv %s736_s22 }
 0x337   : > { %617 = vperm.xlu1 %1379, %v584_v54   ;;  %649 = vperm.xlu0 %1383, %v584_v54  }
 0x33b   : > { %1381 = vset.pattern.permute.xlu1 %v1738_v62  ;;  %1386 = vset.pattern.permute.xlu0 %v1739_v63  ;;  %v744_v62 = vld [vmem:[#allocation3] sm:$0xff] }
 0x33c   : > { %633 = vperm.xlu1 %1381, %v584_v54  }
 0x340   : > { %1382 = vset.pattern.permute.xlu1 %v1740_v0 }
 0x341   : > { %641 = vperm.xlu1 %1382, %v584_v54  }
 0x345   : > { %1384 = vset.pattern.permute.xlu1 %v1741_v1 }
 0x346   : > { %657 = vperm.xlu1 %1384, %v584_v54  }
 0x34a   : > { %1385 = vset.pattern.permute.xlu1 %v1739_v63  ;;  %v745_v63 = vstv %s732_s23  ;;  %s1552_s23 = scalar_lea.vmem %s947_s21, 64 }
 0x34b   : > { %665 = vperm.xlu1 %1385, %v584_v54   ;;  %p1553_p2 = scmp.ne.s32.totalorder %s947_s21, %s1552_s23  ;;  %p1560_p5 = scmp.lt.s32.totalorder %s1558_s24, %s1552_s23 }
 0x34d   : > { %p1554_p11 = pnand %p1553_p2, %p2414_p13  ;;  %p1561_p0 = por %p1560_p5, %p1559_p8 }
 0x34f   : > { %p1555_p4 = pneg %p1554_p11 }
 0x351   : > { %p1562_p7 = pnand %p1561_p0, %p1555_p4 }
 0x3a0   : > { %v712_v2 = vpop.f32.mrb[0].mxu1 }
 0x3a1   : > { %v1193_v3 = vpop.f32.mrb[1].mxu1 }
 0x3a2   : > { %v715_v4 = vpop.f32.mrb[2].mxu1 }
 0x3a3   : > { %v1194_v5 = vpop.f32.mrb[3].mxu1 }
 0x3ac   : > { %v602_v6 = vpop.permute.xlu1 %601  ;;  %v594_v9 = vpop.permute.xlu0 %593 }
 0x3ad   : > { %v604_v11 = vmul.f32 %v602_v6, %v2169_v7  ;;  %v596_v12 = vmul.f32 %v594_v9, %v2171_v8 }
 0x3af   : > { %v605_v16 = vadd.f32 %v604_v11, %v596_v12 }
 0x3b1   : > { %v610_v13 = vpop.permute.xlu1 %609  ;;  %v626_v21 = vpop.permute.xlu0 %625 }
 0x3b2   : > { %v612_v14 = vmul.f32 %v610_v13, %v2173_v10  ;;  %v628_v24 = vmul.f32 %v626_v21, %v2181_v20 }
 0x3b4   : > { %v613_v18 = vadd.f32 %v612_v14, %v605_v16 }
 0x3b6   : > { %v618_v17 = vpop.permute.xlu1 %617  ;;  %v650_v33 = vpop.permute.xlu0 %649 }
 0x3b7   : > { %v620_v19 = vmul.f32 %v618_v17, %v2178_v15  ;;  %v652_v36 = vmul.f32 %v650_v33, %v2190_v32 }
 0x3b9   : > { %v621_v22 = vadd.f32 %v620_v19, %v613_v18 }
 0x3bb   : > { %v634_v25 = vpop.permute.xlu1 %633  ;;  %v629_v26 = vadd.f32 %v628_v24, %v621_v22 }
 0x3bc   : > { %v636_v27 = vmul.f32 %v634_v25, %v2183_v23 }
 0x3be   : > { %v637_v30 = vadd.f32 %v636_v27, %v629_v26 }
 0x3c0   : > { %v642_v29 = vpop.permute.xlu1 %641 }
 0x3c1   : > { %v644_v31 = vmul.f32 %v642_v29, %v2187_v28 }
 0x3c3   : > { %v645_v34 = vadd.f32 %v644_v31, %v637_v30 }
 0x3c5   : > { %v658_v37 = vpop.permute.xlu1 %657  ;;  %v653_v38 = vadd.f32 %v652_v36, %v645_v34 }
 0x3c6   : > { %v660_v39 = vmul.f32 %v658_v37, %v2192_v35 }
 0x3c8   : > { %v661_v42 = vadd.f32 %v660_v39, %v653_v38 }
 0x3ca   : > { %v666_v41 = vpop.permute.xlu1 %665 }
 0x3cb   : > { %v668_v43 = vmul.f32 %v666_v41, %v2196_v40 }
 0x3cd   : > { %v669_v44 = vadd.f32 %v668_v43, %v661_v42 }
 0x3cf   : > { %v713_v45 = vadd.f32 %v712_v2, %v669_v44  ;;  %v746_v2 = vmul.f32 %v745_v63, %v744_v62 }
 0x3d1   : > { %v718_v47 = vmul.f32 0.35355338, %v713_v45 }
 0x3d3   : > { %v720_v49 = vadd.f32 %v719_v46, %v718_v47 }
 0x3d5   : > { %v721_v50 = vsel %vm543_vm12, %v720_v49, -inf }
 0x3d6   : > { %722 = vmax.xlane.f32.xlu0 %v721_v50 }
 0x3ec   : > { %761 = vrot.lane.b32.xlu0 %v2162_v48, %s1742_s19  ;;  %v740_v48 = vld [vmem:[#allocation2] sm:$0xff]  ;;  %s916_s19 = scalar_lea.sflag [#allocation19], %s2116_s12 }
 0x3ed   : > { %v742_v0 = vmul.f32 %v741_v59, %v740_v48 }
 0x463   : > { %v723_v51 = vpop.xlane.xlu0 %722 }
 0x464   : > { %v724_v52 = vsub.f32 %v720_v49, %v723_v51 }
 0x466   : > { %v725_v53 = vmul.f32 1.442695, %v724_v52 }
 0x467   : > { %v762_v56 = vpop.permute.xlu0 %761 }
 0x468   : > { %1389 = vpow2.f32 %v725_v53  ;;  %v768_v57 = vsel %vm766_vm14, %v762_v56, 0 }
 0x469   : > { %1196 = vmatpush3.bf16.msra.mxu0 %v768_v57 }
 0x472   : > { %v1390_v54 = vpop.eup %1389 }
 0x473   : > { %v727_v55 = vsel %vm543_vm12, %v1390_v54, 0.0 }
 0x474   : > { %728 = vadd.xlane.f32.xlu1 %v727_v55 }
 0x501   : > { %v729_v58 = vpop.xlane.xlu1 %728 }
 0x502   : > { %1391 = vrcp.f32 %v729_v58 }
 0x50c   : > { %v1392_v60 = vpop.eup %1391 }
 0x50d   : > { %v731_v1 = vmul.f32 %v1392_v60, %v1390_v54 }
 0x50f   : > { %v739_v3 = vmul.f32 %v738_v61, %v731_v1 }
 0x511   : > { %v743_v4 = vadd.f32 %v742_v0, %v739_v3 }
 0x513   : > { %v747_v5 = vadd.f32 %v746_v2, %v743_v4 }
 0x515   : > { %v748_v6 = vpack.c.bf16 %v747_v5, %v747_v5  ;;  %v855_v9 = vmul.f32 %v747_v5, %v2183_v23  ;;  %v752_v11 = vmul.f32 %v747_v5, %v2171_v8  ;;  %v811_v14 = vmul.f32 %v747_v5, %v2169_v7 }
 0x516   : > { %v822_v17 = vmul.f32 %v747_v5, %v2173_v10  ;;  %v833_v8 = vmul.f32 %v747_v5, %v2178_v15  ;;  %v844_v21 = vmul.f32 %v747_v5, %v2181_v20  ;;  %v866_v22 = vmul.f32 %v747_v5, %v2187_v28 }
 0x517   : > { %1198 = vmatmul.mubr.msk.bf16.vlgmr.msra.gmra.mrb[4].mxu0 %vm543_vm12, %v748_v6  ;;  %v856_v12 = vsel %vm543_vm12, %v855_v9, 0.0  ;;  %v753_v13 = vsel %vm543_vm12, %v752_v11, 0.0  ;;  %750 = vst.msk [vmem:[%s2139_s20] sm:$0xf] %vm749_vm15, %v748_v6  ;;  %v812_v16 = vsel %vm543_vm12, %v811_v14, 0.0  ;;  %v877_v23 = vmul.f32 %v747_v5, %v2190_v32 }
 0x518   : > { %857 = vadd.xlane.f32.xlu0 %v856_v12  ;;  %754 = vadd.xlane.f32.xlu1 %v753_v13  ;;  %v823_v18 = vsel %vm543_vm12, %v822_v17, 0.0  ;;  %v834_v19 = vsel %vm543_vm12, %v833_v8, 0.0  ;;  %v845_v7 = vsel %vm543_vm12, %v844_v21, 0.0  ;;  %v867_v10 = vsel %vm543_vm12, %v866_v22, 0.0 }
 0x519   : > { %v878_v15 = vsel %vm543_vm12, %v877_v23, 0.0  ;;  %v888_v24 = vmul.f32 %v747_v5, %v2192_v35  ;;  %v899_v25 = vmul.f32 %v747_v5, %v2196_v40 }
 0x51b   : > { %v889_v20 = vsel %vm543_vm12, %v888_v24, 0.0  ;;  %v900_v26 = vsel %vm543_vm12, %v899_v25, 0.0 }
 0x51c   : > { %813 = vadd.xlane.f32.xlu1 %v812_v16 }
 0x520   : > { %824 = vadd.xlane.f32.xlu1 %v823_v18 }
 0x524   : > { %835 = vadd.xlane.f32.xlu1 %v834_v19 }
 0x528   : > { %846 = vadd.xlane.f32.xlu1 %v845_v7 }
 0x52c   : > { %868 = vadd.xlane.f32.xlu1 %v867_v10 }
 0x530   : > { %879 = vadd.xlane.f32.xlu1 %v878_v15 }
 0x534   : > { %890 = vadd.xlane.f32.xlu1 %v889_v20 }
 0x538   : > { %901 = vadd.xlane.f32.xlu1 %v900_v26 }
 0x539   : > { %1565 = shalt.err (!%p1562_p7)
}
 0x53a   : > { %s1566_s20 = scalar_lea.hbm %s2233_s14, 64  ;;  %s1570_s15 = scalar_lea.hbm %s2413_s4, 512 }
 0x53b   : > { %p1567_p1 = scmp.ne.s32.totalorder %s2233_s14, %s1566_s20  ;;  %p1571_p9 = scmp.lt.u32.totalorder %s2233_s14, %s2413_s4 }
 0x53c   : > { %p1572_p12 = scmp.lt.u32.totalorder %s1570_s15, %s1566_s20  ;;  %p1574_p2 = scmp.lt.u32.totalorder %s1566_s20, %s2233_s14 }
 0x53d   : > { %p1568_p3 = pnand %p1567_p1, %p2414_p13 }
 0x53e   : > { %p1573_p6 = por %p1572_p12, %p1571_p9 }
 0x53f   : > { %p1569_p10 = pneg %p1568_p3 }
 0x540   : > { %p1575_p11 = por %p1574_p2, %p1573_p6 }
 0x542   : > { %p1576_p4 = pnand %p1575_p11, %p1569_p10 }
 0x544   : > { %1579 = shalt.err (!%p1576_p4)
}
 0x545   : > { %1220 = dma.vmem_to_hbm [thread:$0]  (%p2414_p13), %s947_s21, 64, %s2233_s14, %s916_s19   ;;  %v756_v30 = vlaneseq  ;;  %v534_v33 = vld [vmem:[#allocation16] sm:$0xf]  ;;  %v535_v59 = vld [vmem:[#allocation16 + $0x4] sm:$0x1] }
 0x546   : > { %v536_v35 = vunpack.c.l.bf16 %v534_v33  ;;  %v537_v3 = vunpack.c.l.bf16 %v535_v59  ;;  %s1172_s27 = sshll.u32 %s2226_s25, 7  ;;  %s931_s21 = sshll.u32 %s2137_s30, 4  ;;  %s2260_s21 = int_to_ptr.vmem [resolvable:$true] %s931_s21 }
 0x547   : > { %v757_v32 = vshrl.u32 %v756_v30, 7  ;;  %s2415_s14 = sld [smem:[#allocation40_spill]]  ;;  %s911_s23 = scalar_lea.sflag [#allocation8], %s2116_s12 }
 0x548   : > { %s1580_s18 = scalar_lea.vmem %s2260_s21, 128  ;;  %s1744_s25 = smov [#allocation17]  }
 0x549   : > { %v758_v36 = vsub.s32 0, %v757_v32  ;;  %v817_v37 = vsub.s32 1, %v757_v32  ;;  %v828_v39 = vsub.s32 2, %v757_v32  ;;  %v839_v42 = vsub.s32 3, %v757_v32  ;;  %p1581_p8 = scmp.ne.s32.totalorder %s2260_s21, %s1580_s18  ;;  %s1584_s13 = sshll.u32 %s1744_s25, 4  ;;  %s1585_s13 = int_to_ptr.vmem [resolvable:$false] %s1584_s13 }
 0x54a   : > { %v850_v45 = vsub.s32 4, %v757_v32  ;;  %v861_v47 = vsub.s32 5, %v757_v32  ;;  %v872_v57 = vsub.s32 6, %v757_v32  ;;  %v883_v62 = vsub.s32 7, %v757_v32  ;;  %s1586_s24 = scalar_lea.vmem %s1585_s13, 256  ;;  %p1587_p7 = scmp.lt.s32.totalorder %s2260_s21, %s1585_s13 }
 0x54b   : > { %v759_v38 = vrot.slane %v536_v35, %v758_v36  ;;  %v818_v41 = vrot.slane %v536_v35, %v817_v37  ;;  %v829_v44 = vrot.slane %v536_v35, %v828_v39  ;;  %v840_v50 = vrot.slane %v536_v35, %v839_v42  ;;  %p1582_p5 = pnand %p1581_p8, %p2414_p13  ;;  %p1588_p1 = scmp.lt.s32.totalorder %s1586_s24, %s1580_s18 }
 0x54c   : > { %v851_v56 = vrot.slane %v536_v35, %v850_v45  ;;  %v862_v60 = vrot.slane %v536_v35, %v861_v47  ;;  %v873_v2 = vrot.slane %v536_v35, %v872_v57  ;;  %v884_v9 = vrot.slane %v536_v35, %v883_v62 }
 0x54d   : > { %v895_v13 = vrot.slane %v537_v3, %v758_v36  ;;  %v906_v17 = vrot.slane %v537_v3, %v817_v37  ;;  %s2258_s19 = scalar_lea.hbm %s2415_s14, %s1172_s27  ;;  %p1583_p0 = pneg %p1582_p5 }
 0x54e   : > { %p1589_p3 = por %p1588_p1, %p1587_p7 }
 0x550   : > { %p1590_p10 = pnand %p1589_p3, %p1583_p0 }
 0x5a5   : > { %v755_v27 = vpop.xlane.xlu1 %754  ;;  %v858_v0 = vpop.xlane.xlu0 %857 }
 0x5a6   : > { %v760_v43 = vmul.f32 %v759_v38, %v755_v27  ;;  %v863_v6 = vmul.f32 %v862_v60, %v858_v0 }
 0x5a9   : > { %v814_v28 = vpop.xlane.xlu1 %813 }
 0x5aa   : > { %v819_v49 = vmul.f32 %v818_v41, %v814_v28 }
 0x5ad   : > { %v825_v29 = vpop.xlane.xlu1 %824 }
 0x5ae   : > { %v830_v55 = vmul.f32 %v829_v44, %v825_v29 }
 0x5b1   : > { %v836_v31 = vpop.xlane.xlu1 %835 }
 0x5b2   : > { %v841_v61 = vmul.f32 %v840_v50, %v836_v31 }
 0x5b5   : > { %v847_v34 = vpop.xlane.xlu1 %846 }
 0x5b6   : > { %v852_v1 = vmul.f32 %v851_v56, %v847_v34 }
 0x5b9   : > { %v869_v40 = vpop.xlane.xlu1 %868 }
 0x5ba   : > { %v874_v12 = vmul.f32 %v873_v2, %v869_v40 }
 0x5bd   : > { %v880_v53 = vpop.xlane.xlu1 %879 }
 0x5be   : > { %v885_v16 = vmul.f32 %v884_v9, %v880_v53 }
 0x5c1   : > { %v891_v5 = vpop.xlane.xlu1 %890 }
 0x5c2   : > { %v896_v19 = vmul.f32 %v895_v13, %v891_v5 }
 0x5c5   : > { %v902_v8 = vpop.xlane.xlu1 %901 }
 0x5c6   : > { %v907_v7 = vmul.f32 %v906_v17, %v902_v8 }
 0x5ea   : > { %v804_v46 = vpop.f32.mrb[4].mxu0 }
 0x5eb   : > { %v805_v51 = vadd.f32 %v804_v46, %v760_v43  ;;  %v1199_v52 = vpop.f32.mrb[5].mxu0 }
 0x5ec   : > { %v807_v54 = vpop.f32.mrb[6].mxu0 }
 0x5ed   : > { %v820_v58 = vadd.f32 %v819_v49, %v805_v51  ;;  %v1200_v48 = vpop.f32.mrb[7].mxu0 }
 0x5ef   : > { %v831_v63 = vadd.f32 %v830_v55, %v820_v58 }
 0x5f1   : > { %v842_v4 = vadd.f32 %v841_v61, %v831_v63 }
 0x5f3   : > { %v853_v11 = vadd.f32 %v852_v1, %v842_v4 }
 0x5f5   : > { %v864_v14 = vadd.f32 %v863_v6, %v853_v11 }
 0x5f7   : > { %v875_v18 = vadd.f32 %v874_v12, %v864_v14 }
 0x5f9   : > { %v886_v21 = vadd.f32 %v885_v16, %v875_v18 }
 0x5fb   : > { %v897_v22 = vadd.f32 %v896_v19, %v886_v21 }
 0x5fd   : > { %v908_v10 = vadd.f32 %v907_v7, %v897_v22 }
 0x5ff   : > { %909 = vst.msk [vmem:[%s2137_s30] sm:$0xff] %vm543_vm12, %v908_v10 }
 0x600   : > { %1593 = shalt.err (!%p1590_p10)
}
 0x601   : > { %s1594_s12 = scalar_lea.hbm %s2258_s19, 128  ;;  %s1598_s0 = scalar_lea.hbm %s2415_s14, 1024 }
 0x602   : > { %p1595_p9 = scmp.ne.s32.totalorder %s2258_s19, %s1594_s12  ;;  %p1599_p2 = scmp.lt.u32.totalorder %s2258_s19, %s2415_s14 }
 0x603   : > { %p1600_p11 = scmp.lt.u32.totalorder %s1598_s0, %s1594_s12  ;;  %p1602_p8 = scmp.lt.u32.totalorder %s1594_s12, %s2258_s19 }
 0x604   : > { %p1596_p12 = pnand %p1595_p9, %p2414_p13 }
 0x605   : > { %p1601_p4 = por %p1600_p11, %p1599_p2 }
 0x606   : > { %p1597_p6 = pneg %p1596_p12 }
 0x607   : > { %p1603_p5 = por %p1602_p8, %p1601_p4 }
 0x609   : > { %p1604_p0 = pnand %p1603_p5, %p1597_p6 }
 0x60b   : > { %1607 = shalt.err (!%p1604_p0)
}
 0x60c   : > { %1219 = dma.vmem_to_hbm [thread:$0]  (%p2414_p13), %s2260_s21, 128, %s2258_s19, %s911_s23  }
 0x60d PF: > { %s2416_s8 = sld [smem:[#allocation27_spill]]  ;;  %s2417_s6 = sld [smem:[#allocation35_spill]] }
 0x60e   : > { %p1257_p7 = scmp.ge.s32.totalorder %s1718_s11, 2 }
 0x613   : > { %s958_s27 = sand.u32 1, %s2416_s8   ;;  %p2418_p1 = scmp.ne.s32.totalorder %s2417_s6, 0 }
 0x614   : > { %s959_s17 = scalar_lea.sflag [#allocation8], %s958_s27 }
 0x615   : > { %p1244_p3 = pnand %p1257_p7, %p2418_p1 }
 0x617   : > { %1669 = dma.done.wait (!%p1244_p3), %s959_s17, 128  }
 0x618   : > { %1671 = vsyncadd (!%p1244_p3), %s959_s17, 4294967168  ;;  %s968_s7 = scalar_lea.sflag [#allocation19], %s958_s27 }
 0x619   : > { %1673 = dma.done.wait (!%p1244_p3), %s968_s7, 64  }
 0x61a   : > { %1675 = vsyncadd (!%p1244_p3), %s968_s7, 4294967232  ;;  %s32_s11 = sadd.s32 1, %s1718_s11   ;;  %s2419_s24 = sld [smem:[#allocation26_spill]] }
 0x61b   : > { %p29_p10 = scmp.ge.s32.totalorder %s32_s11, 10   ;;  %s2420_s5 = sld [smem:[#allocation31_spill]] }
 0x61c   : > { %s2421_s21 = sld [smem:[#allocation33_spill]]  ;;  %s2422_s25 = smov %s1686_s26 }
 0x61d   : > { %s2423_s26 = smov %s2028_s2  ;;  %s2424_s27 = smov %s1694_s28 }
 0x61e   : > { %s2425_s28 = smov %s1698_s29  ;;  %s2426_s29 = smov %s2031_s16 }
 0x61f   : > { %s2427_s30 = smov %s1710_s9  ;;  %s2428_s8 = smov %s1714_s10 }
 0x620   :  { %31 = sbr.rel (!%p29_p10) target bundleno = 22 (0x16), region = 165 }
 0x621   : > { %s2429_s9 = smov %s2420_s5 }
 0x622   : > { %s2430_s10 = smov %s2421_s21 }
 0x627   :  { %973 = vsyncpa [#allocation7], 1 }
 0x628   :  { %975 = vsyncpa [#allocation7 + $0x1], 1 }
 0x629   :  { %976 = vsyncpa [#allocation12], 1 }
 0x62a   :  { %978 = vsyncpa [#allocation12 + $0x1], 1 }
 0x62b   :  { %979 = vsyncpa [#allocation15], 1 }
 0x62c   :  { %980 = vsyncpa [#allocation8], 1 }
 0x62d   :  { %982 = vsyncpa [#allocation8 + $0x1], 1 }
 0x62e   :  { %983 = vsyncpa [#allocation19], 1 }
 0x62f   :  { %985 = vsyncpa [#allocation19 + $0x1], 1 }
 0x630   :  { %986 = vsyncpa [#allocation9], 1 }
 0x631   :  { %988 = vsyncpa [#allocation9 + $0x1], 1 }

</bundles_post_ra>
